<compile_context>
chip_gen: v7x
topology: tpu7x:2x2x1
jax: 0.10.0
libtpu: 0.0.40
codegen_flags: <defaults>
</compile_context>

<pallas_src>
from functools import partial

import numpy as np
import jax
import jax.numpy as jnp
from jax import lax
from jax.experimental import pallas as pl
from jax.experimental.pallas import tpu as pltpu

POS_THRESH = 0.1
NEG_SENTINEL = -1.0   # masked losses are >= 0, so -1 never enters a top-k pool
SUB = 8               # f32 sublanes per vreg
TEMP_TILES = 10       # conservative count of live tile-sized in-kernel temporaries


def _round_up(x, m):
    return ((x + m - 1) // m) * m


def _vmem_budget_bytes():
    """Conservative per-core VMEM budget, queried per generation when possible."""
    phys = None
    try:
        phys = getattr(pltpu.get_tpu_info(), "vmem_capacity_bytes", None)
    except Exception:
        phys = None
    if not phys:
        phys = 64 * 1024 * 1024          # assume v7x (smallest VMEM of v5e/v6e/v7x)
    return int(min(phys * 6 // 10, 48 * 1024 * 1024))


def _choose_tiling(n_pix, budget):
    """Pick (lane_tile, m_pad, n_tiles) for the (B, 8, m_pad) layout.

    Blocks are sized by BYTES under a VMEM budget (inputs double-buffered +
    in-kernel temporaries + the per-row negative-loss scratch), preferring a
    tile that divides the row exactly so no lane padding is needed.
    """
    m0 = _round_up(n_pix, SUB) // SUB
    m128 = _round_up(m0, 128)

    def footprint(tl, m_pad):
        # 5 inputs x 2 pipeline buffers + ~TEMP_TILES tile-sized temporaries
        # + 2 per-row neg-loss scratch buffers, plus 1 MiB slack.
        return ((5 * 2 + TEMP_TILES) * SUB * tl + 2 * SUB * m_pad) * 4 + (1 << 20)

    if footprint(m128, m128) <= budget:
        return m128, m128, 1              # whole row in one block (typical CRAFT maps)

    # TODO(synk): rows much larger than ~4M pixels would need an HBM-resident
    # candidate buffer instead of the in-VMEM per-row scratch.
    tl_cap = (budget - (1 << 20) - 2 * SUB * m128 * 4) // ((5 * 2 + TEMP_TILES) * SUB * 4)
    tl_cap = max(128, min((tl_cap // 128) * 128, 65536, m128))
    best_div, t = 0, 128
    while t <= tl_cap:                    # prefer a tile that divides the row exactly
        if m128 % t == 0:
            best_div = t
        t += 128
    tl = best_div if best_div * 2 >= tl_cap else tl_cap
    m_pad = _round_up(m0, tl)
    return tl, m_pad, m_pad // tl


# ---------------------------------------------------------------------------
# Fused kernel: per-row streaming stats + in-VMEM threshold-select top-k sum
# ---------------------------------------------------------------------------
def _maploss_kernel(gh_ref, gah_ref, pgh_ref, pgah_ref, mask_ref,   # inputs (8, TL)
                    out_ref,                                         # output (1, 8)
                    ps_g, pc_g, ts_g, ps_a, pc_a, ts_a,              # (8,128) accumulators
                    neg_g, neg_a,                                    # (8, M_pad) row buffers
                    *, lane_tile, k_nopos, n_iter):
    j = pl.program_id(1)

    @pl.when(j == 0)
    def _init():
        for acc in (ps_g, pc_g, ts_g, ps_a, pc_a, ts_a):
            acc[...] = jnp.zeros_like(acc)

    mask = mask_ref[...]
    start = pl.multiple_of(j * lane_tile, 128)

    def lane_accum(x):
        # Fold a (8, lane_tile) tile into an (8, 128) partial with plain VPU
        # adds (tree-fold; no per-tile cross-lane/XLU reduction).
        c = x.shape[1] // 128
        while c % 2 == 0 and c > 1:
            half = (c // 2) * 128
            x = x[:, :half] + x[:, half:]
            c //= 2
        p = x[:, 0:128]
        for i in range(1, c):
            p = p + x[:, i * 128:(i + 1) * 128]
        return p

    def process_map(label, pred, ps, pc, ts, neg_ref):
        d = pred - label
        loss = d * d * mask                       # MSELoss(reduce=False) * mask, >= 0
        pos = label >= POS_THRESH
        pos_f = pos.astype(jnp.float32)
        ps[...] += lane_accum(loss * pos_f)
        pc[...] += lane_accum(pos_f)
        ts[...] += lane_accum(loss)
        # negative-pixel-only losses for this tile, kept resident in VMEM
        neg_ref[:, pl.ds(start, lane_tile)] = jnp.where(pos, NEG_SENTINEL, loss)

    process_map(gh_ref[...], pgh_ref[...], ps_g, pc_g, ts_g, neg_g)
    process_map(gah_ref[...], pgah_ref[...], ps_a, pc_a, ts_a, neg_a)

    @pl.when(j == pl.num_programs(1) - 1)
    def _finalize():
        # All values stay (1, 1)-shaped (never rank-0) for clean Mosaic lowering.
        def _sum11(x):
            return jnp.sum(jnp.sum(x, axis=1, keepdims=True), axis=0, keepdims=True)

        def _max11(x):
            return jnp.max(jnp.max(x, axis=1, keepdims=True), axis=0, keepdims=True)

        psg = _sum11(ps_g[...]); pcg = _sum11(pc_g[...]); tsg = _sum11(ts_g[...])
        psa = _sum11(ps_a[...]); pca = _sum11(pc_a[...]); tsa = _sum11(ts_a[...])

        def topk_sum(neg_ref, pos_cnt):
            """Sum of the k largest negative-pixel losses of this row.

            k = 3*pos_cnt when there are positives, else min(500, N).  The
            k-th-largest threshold is found by value-domain bisection (counts
            are exact integers in f32), then
                sum(v >= hi) + (k - cnt(v >= hi)) * lo
            is exact up to the final bracket width (~max * 2^-n_iter) and is
            exactly right for ties at lo.  When k exceeds the candidate count
            (pos_cnt > 0 and neg_cnt < 3*pos_cnt) the value is finite garbage
            that the wrapper's jnp.where discards -- same contract as torch,
            which only takes the top-k branch when neg_cnt >= 3*pos_cnt.
            """
            k = jnp.where(pos_cnt > 0.0, 3.0 * pos_cnt, float(k_nopos))
            hi0 = jnp.maximum(_max11(neg_ref[...]), 0.0) * (1.0 + 2.0 ** -8) + 1e-30
            lo0 = jnp.zeros_like(hi0)

            def body(_, carry):
                lo, hi = carry
                mid = 0.5 * (lo + hi)
                cnt = _sum11(jnp.where(neg_ref[...] >= mid, 1.0, 0.0))
                ge = cnt >= k
                return jnp.where(ge, mid, lo), jnp.where(ge, hi, mid)

            lo, hi = lax.fori_loop(0, n_iter, body, (lo0, hi0))
            v = neg_ref[...]
            above = v >= hi
            s_above = _sum11(jnp.where(above, v, 0.0))
            c_above = _sum11(jnp.where(above, 1.0, 0.0))
            return s_above + (k - c_above) * lo

        sel_g = topk_sum(neg_g, pcg)
        sel_a = topk_sum(neg_a, pca)

        # tiny once-per-row store; columns:
        # [pos_sum_g, pos_cnt_g, tot_sum_g, topk_sum_g,
        #  pos_sum_a, pos_cnt_a, tot_sum_a, topk_sum_a]
        out_ref[...] = jnp.concatenate(
            [psg, pcg, tsg, sel_g, psa, pca, tsa, sel_a], axis=1)


# ---------------------------------------------------------------------------
# Wrapper
# ---------------------------------------------------------------------------
def maploss_pallas(gh_label, gah_label, p_gh, p_gah, mask, *, n_bisect=32):
    f32 = jnp.float32
    B = gh_label.shape[0]
    N = int(np.prod(gh_label.shape[1:]))

    budget = _vmem_budget_bytes()
    TL, M_pad, n_tiles = _choose_tiling(N, budget)
    N_pad = SUB * M_pad

    def prep(x):
        x = jnp.asarray(x, dtype=f32).reshape(B, N)
        if N_pad != N:
            # zero padding: label 0 (<0.1) and mask 0 => inert (see header note)
            x = jnp.pad(x, ((0, 0), (0, N_pad - N)))
        return x.reshape(B, SUB, M_pad)

    gh, gah, pgh, pgah, msk = (prep(x) for x in (gh_label, gah_label, p_gh, p_gah, mask))

    kern = partial(_maploss_kernel, lane_tile=TL, k_nopos=min(500, N), n_iter=n_bisect)
    in_spec = pl.BlockSpec((None, SUB, TL), lambda b, j: (b, 0, j))

    stats = pl.pallas_call(
        kern,
        grid=(B, n_tiles),
        in_specs=[in_spec] * 5,
        out_specs=pl.BlockSpec((None, 1, 8), lambda b, j: (b, 0, 0)),
        out_shape=jax.ShapeDtypeStruct((B, 1, 8), f32),
        scratch_shapes=[pltpu.VMEM((SUB, 128), f32)] * 6
                     + [pltpu.VMEM((SUB, M_pad), f32)] * 2,
        compiler_params=pltpu.CompilerParams(
            dimension_semantics=("parallel", "arbitrary"),
            vmem_limit_bytes=int(budget)),
    )(gh, gah, pgh, pgah, msk)

    # --- O(B) branch selection / final combine in plain JAX -----------------
    s = stats.reshape(B, 8)
    k5 = float(min(500, N))

    def map_loss(ps, pc, ts, sel):
        neg_cnt = float(N) - pc
        k_top = 3.0 * pc
        pos_mean = ps / jnp.maximum(pc, 1.0)
        # NaN iff neg_cnt == 0 in the selected branch, matching torch's mean of
        # an empty tensor (forward only; gradients would need a guard).
        neg_mean = (ts - ps) / neg_cnt
        topk_mean = sel / jnp.maximum(k_top, 1.0)
        top500_mean = sel / k5
        has_pos = pc > 0.0
        nega = jnp.where(has_pos,
                         jnp.where(neg_cnt < k_top, neg_mean, topk_mean),
                         top500_mean)
        posi = jnp.where(has_pos, pos_mean, 0.0)
        return jnp.sum(posi + nega)

    char = map_loss(s[:, 0], s[:, 1], s[:, 2], s[:, 3])
    affi = map_loss(s[:, 4], s[:, 5], s[:, 6], s[:, 7])
    return (char + affi) / float(B)


# ---------------------------------------------------------------------------
# Reference (pure numpy, float64) replication of the PyTorch Maploss forward.
# ---------------------------------------------------------------------------
def _reference(gh, gah, pgh, pgah, mask):
    gh, gah, pgh, pgah, mask = (np.asarray(a, np.float64) for a in (gh, gah, pgh, pgah, mask))

    def cum(pre, lab):
        B = pre.shape[0]
        pre = pre.reshape(B, -1)
        lab = lab.reshape(B, -1)
        s = 0.0
        for i in range(B):
            pos = lab[i] >= POS_THRESH
            neg = ~pos
            n_pos = int(pos.sum())
            n_neg = int(neg.sum())
            if n_pos != 0:
                s += pre[i][pos].mean()
                if n_neg < 3 * n_pos:
                    s += pre[i][neg].mean()
                else:
                    s += np.sort(pre[i][neg])[::-1][:3 * n_pos].mean()
            else:
                s += np.sort(pre[i])[::-1][:500].mean()
        return s

    loss_g = (pgh - gh) ** 2 * mask
    loss_a = (pgah - gah) ** 2 * mask
    B = gh.shape[0]
    return cum(loss_g, gh) / B + cum(loss_a, gah) / B


if __name__ == "__main__":
    f32 = jnp.float32

    # --- test 1: 96x96 maps, exercises all three branches --------------------
    B, H, W = 2, 96, 96
    key = jax.random.PRNGKey(0)
    k1, k2, k3, k4, k5 = jax.random.split(key, 5)
    # gh row 0: no positives -> top-500 branch; gh row 1: ~23% positives with
    # >= 3x negatives -> top-3k branch; gah: mostly positive -> neg-mean branch.
    gh_label = jax.random.uniform(k1, (B, H, W), f32) * 0.13
    gh_label = gh_label * jnp.array([0.0, 1.0], f32).reshape(B, 1, 1)
    gah_label = jax.random.uniform(k2, (B, H, W), f32)
    p_gh = jax.random.uniform(k3, (B, H, W), f32)
    p_gah = jax.random.uniform(k4, (B, H, W), f32)
    mask = (jax.random.uniform(k5, (B, H, W), f32) > 0.2).astype(f32)

    out = jax.block_until_ready(maploss_pallas(gh_label, gah_label, p_gh, p_gah, mask))
    ref = _reference(gh_label, gah_label, p_gh, p_gah, mask)
    np.testing.assert_allclose(np.asarray(out, np.float64), ref, rtol=1e-4, atol=1e-5)

    # --- test 2: awkward shape (N=2300, not a multiple of 1024) -> padding path
    B2, H2, W2 = 3, 50, 46
    q1, q2, q3, q4, q5 = jax.random.split(jax.random.PRNGKey(1), 5)
    gh2 = jax.random.uniform(q1, (B2, H2, W2), f32) * 0.12
    gh2 = gh2 * jnp.array([0.0, 1.0, 1.0], f32).reshape(B2, 1, 1)
    gah2 = jax.random.uniform(q2, (B2, H2, W2), f32)
    pgh2 = jax.random.uniform(q3, (B2, H2, W2), f32)
    pgah2 = jax.random.uniform(q4, (B2, H2, W2), f32)
    mask2 = (jax.random.uniform(q5, (B2, H2, W2), f32) > 0.2).astype(f32)

    out2 = jax.block_until_ready(maploss_pallas(gh2, gah2, pgh2, pgah2, mask2))
    ref2 = _reference(gh2, gah2, pgh2, pgah2, mask2)
    np.testing.assert_allclose(np.asarray(out2, np.float64), ref2, rtol=1e-4, atol=1e-5)

    print("KERNEL_OK")
</pallas_src>

<mosaic_0001>
module attributes {stable_mosaic.version = 11 : i64} {
  func.func @_maploss_kernel(%arg0: i32, %arg1: i32, %arg2: memref<1x8x1152xf32, #tpu.memory_space<vmem>>, %arg3: memref<1x8x1152xf32, #tpu.memory_space<vmem>>, %arg4: memref<1x8x1152xf32, #tpu.memory_space<vmem>>, %arg5: memref<1x8x1152xf32, #tpu.memory_space<vmem>>, %arg6: memref<1x8x1152xf32, #tpu.memory_space<vmem>>, %arg7: memref<1x1x8xf32, #tpu.memory_space<vmem>>, %arg8: memref<8x128xf32, #tpu.memory_space<vmem>>, %arg9: memref<8x128xf32, #tpu.memory_space<vmem>>, %arg10: memref<8x128xf32, #tpu.memory_space<vmem>>, %arg11: memref<8x128xf32, #tpu.memory_space<vmem>>, %arg12: memref<8x128xf32, #tpu.memory_space<vmem>>, %arg13: memref<8x128xf32, #tpu.memory_space<vmem>>, %arg14: memref<8x1152xf32, #tpu.memory_space<vmem>>, %arg15: memref<8x1152xf32, #tpu.memory_space<vmem>>) attributes {dimension_semantics = [#tpu.dimension_semantics<parallel>, #tpu.dimension_semantics<arbitrary>], iteration_bounds = array<i64: 2, 1>, scalar_prefetch = 0 : i64, scratch_operands = 8 : i64, tpu.core_type = #tpu.core_type<tc>, window_params = [{transform_indices = @transform_0, window_bounds = array<i64: 1, 8, 1152>}, {transform_indices = @transform_1, window_bounds = array<i64: 1, 8, 1152>}, {transform_indices = @transform_2, window_bounds = array<i64: 1, 8, 1152>}, {transform_indices = @transform_3, window_bounds = array<i64: 1, 8, 1152>}, {transform_indices = @transform_4, window_bounds = array<i64: 1, 8, 1152>}, {transform_indices = @transform_5, window_bounds = array<i64: 1, 1, 8>}]} {
    %c0_i32 = arith.constant 0 : i32
    %0 = arith.cmpi eq, %arg1, %c0_i32 : i32
    %1 = arith.extui %0 : i1 to i32
    %c0_i32_0 = arith.constant 0 : i32
    %2 = arith.cmpi ne, %1, %c0_i32_0 : i32
    scf.if %2 {
      %cst_46 = arith.constant 0.000000e+00 : f32
      %162 = vector.broadcast %cst_46 : f32 to vector<8x128xf32>
      %c0_47 = arith.constant 0 : index
      %c0_48 = arith.constant 0 : index
      %163 = vector.load %arg8[%c0_47, %c0_48] : memref<8x128xf32, #tpu.memory_space<vmem>>, vector<8x128xf32>
      tpu.vector_store %arg8[%c0_47, %c0_48], %162 {strides = array<i32>} : memref<8x128xf32, #tpu.memory_space<vmem>>, vector<8x128xf32>,
      %cst_49 = arith.constant 0.000000e+00 : f32
      %164 = vector.broadcast %cst_49 : f32 to vector<8x128xf32>
      %c0_50 = arith.constant 0 : index
      %c0_51 = arith.constant 0 : index
      %165 = vector.load %arg9[%c0_50, %c0_51] : memref<8x128xf32, #tpu.memory_space<vmem>>, vector<8x128xf32>
      tpu.vector_store %arg9[%c0_50, %c0_51], %164 {strides = array<i32>} : memref<8x128xf32, #tpu.memory_space<vmem>>, vector<8x128xf32>,
      %cst_52 = arith.constant 0.000000e+00 : f32
      %166 = vector.broadcast %cst_52 : f32 to vector<8x128xf32>
      %c0_53 = arith.constant 0 : index
      %c0_54 = arith.constant 0 : index
      %167 = vector.load %arg10[%c0_53, %c0_54] : memref<8x128xf32, #tpu.memory_space<vmem>>, vector<8x128xf32>
      tpu.vector_store %arg10[%c0_53, %c0_54], %166 {strides = array<i32>} : memref<8x128xf32, #tpu.memory_space<vmem>>, vector<8x128xf32>,
      %cst_55 = arith.constant 0.000000e+00 : f32
      %168 = vector.broadcast %cst_55 : f32 to vector<8x128xf32>
      %c0_56 = arith.constant 0 : index
      %c0_57 = arith.constant 0 : index
      %169 = vector.load %arg11[%c0_56, %c0_57] : memref<8x128xf32, #tpu.memory_space<vmem>>, vector<8x128xf32>
      tpu.vector_store %arg11[%c0_56, %c0_57], %168 {strides = array<i32>} : memref<8x128xf32, #tpu.memory_space<vmem>>, vector<8x128xf32>,
      %cst_58 = arith.constant 0.000000e+00 : f32
      %170 = vector.broadcast %cst_58 : f32 to vector<8x128xf32>
      %c0_59 = arith.constant 0 : index
      %c0_60 = arith.constant 0 : index
      %171 = vector.load %arg12[%c0_59, %c0_60] : memref<8x128xf32, #tpu.memory_space<vmem>>, vector<8x128xf32>
      tpu.vector_store %arg12[%c0_59, %c0_60], %170 {strides = array<i32>} : memref<8x128xf32, #tpu.memory_space<vmem>>, vector<8x128xf32>,
      %cst_61 = arith.constant 0.000000e+00 : f32
      %172 = vector.broadcast %cst_61 : f32 to vector<8x128xf32>
      %c0_62 = arith.constant 0 : index
      %c0_63 = arith.constant 0 : index
      %173 = vector.load %arg13[%c0_62, %c0_63] : memref<8x128xf32, #tpu.memory_space<vmem>>, vector<8x128xf32>
      tpu.vector_store %arg13[%c0_62, %c0_63], %172 {strides = array<i32>} : memref<8x128xf32, #tpu.memory_space<vmem>>, vector<8x128xf32>,
    } else {
    }
    %c0 = arith.constant 0 : index
    %c0_1 = arith.constant 0 : index
    %c0_2 = arith.constant 0 : index
    %3 = vector.load %arg6[%c0, %c0_1, %c0_2] : memref<1x8x1152xf32, #tpu.memory_space<vmem>>, vector<1x8x1152xf32>
    %4 = vector.shape_cast %3 : vector<1x8x1152xf32> to vector<8x1152xf32>
    %c1152_i32 = arith.constant 1152 : i32
    %5 = arith.muli %arg1, %c1152_i32 : i32
    %6 = tpu.assume_multiple %5, 128 : i32
    %c0_3 = arith.constant 0 : index
    %c0_4 = arith.constant 0 : index
    %c0_5 = arith.constant 0 : index
    %7 = vector.load %arg2[%c0_3, %c0_4, %c0_5] : memref<1x8x1152xf32, #tpu.memory_space<vmem>>, vector<1x8x1152xf32>
    %8 = vector.shape_cast %7 : vector<1x8x1152xf32> to vector<8x1152xf32>
    %c0_6 = arith.constant 0 : index
    %c0_7 = arith.constant 0 : index
    %c0_8 = arith.constant 0 : index
    %9 = vector.load %arg4[%c0_6, %c0_7, %c0_8] : memref<1x8x1152xf32, #tpu.memory_space<vmem>>, vector<1x8x1152xf32>
    %10 = vector.shape_cast %9 : vector<1x8x1152xf32> to vector<8x1152xf32>
    %11 = arith.subf %10, %8 : vector<8x1152xf32>
    %12 = arith.mulf %11, %11 : vector<8x1152xf32>
    %13 = arith.mulf %12, %4 : vector<8x1152xf32>
    %cst = arith.constant 1.000000e-01 : f32
    %14 = vector.broadcast %cst : f32 to vector<8x1152xf32>
    %15 = arith.cmpf oge, %8, %14 : vector<8x1152xf32>
    %16 = arith.extui %15 : vector<8x1152xi1> to vector<8x1152xi32>
    %17 = arith.sitofp %16 : vector<8x1152xi32> to vector<8x1152xf32>
    %c0_9 = arith.constant 0 : index
    %c0_10 = arith.constant 0 : index
    %18 = vector.load %arg8[%c0_9, %c0_10] : memref<8x128xf32, #tpu.memory_space<vmem>>, vector<8x128xf32>
    %19 = arith.mulf %13, %17 : vector<8x1152xf32>
    %20 = vector.extract_strided_slice %19 {offsets = [0, 0], sizes = [8, 128], strides = [1, 1]} : vector<8x1152xf32> to vector<8x128xf32>
    %21 = vector.extract_strided_slice %19 {offsets = [0, 128], sizes = [8, 128], strides = [1, 1]} : vector<8x1152xf32> to vector<8x128xf32>
    %22 = arith.addf %20, %21 : vector<8x128xf32>
    %23 = vector.extract_strided_slice %19 {offsets = [0, 256], sizes = [8, 128], strides = [1, 1]} : vector<8x1152xf32> to vector<8x128xf32>
    %24 = arith.addf %22, %23 : vector<8x128xf32>
    %25 = vector.extract_strided_slice %19 {offsets = [0, 384], sizes = [8, 128], strides = [1, 1]} : vector<8x1152xf32> to vector<8x128xf32>
    %26 = arith.addf %24, %25 : vector<8x128xf32>
    %27 = vector.extract_strided_slice %19 {offsets = [0, 512], sizes = [8, 128], strides = [1, 1]} : vector<8x1152xf32> to vector<8x128xf32>
    %28 = arith.addf %26, %27 : vector<8x128xf32>
    %29 = vector.extract_strided_slice %19 {offsets = [0, 640], sizes = [8, 128], strides = [1, 1]} : vector<8x1152xf32> to vector<8x128xf32>
    %30 = arith.addf %28, %29 : vector<8x128xf32>
    %31 = vector.extract_strided_slice %19 {offsets = [0, 768], sizes = [8, 128], strides = [1, 1]} : vector<8x1152xf32> to vector<8x128xf32>
    %32 = arith.addf %30, %31 : vector<8x128xf32>
    %33 = vector.extract_strided_slice %19 {offsets = [0, 896], sizes = [8, 128], strides = [1, 1]} : vector<8x1152xf32> to vector<8x128xf32>
    %34 = arith.addf %32, %33 : vector<8x128xf32>
    %35 = vector.extract_strided_slice %19 {offsets = [0, 1024], sizes = [8, 128], strides = [1, 1]} : vector<8x1152xf32> to vector<8x128xf32>
    %36 = arith.addf %34, %35 : vector<8x128xf32>
    %37 = arith.addf %18, %36 : vector<8x128xf32>
    %c0_11 = arith.constant 0 : index
    %c0_12 = arith.constant 0 : index
    %38 = vector.load %arg8[%c0_11, %c0_12] : memref<8x128xf32, #tpu.memory_space<vmem>>, vector<8x128xf32>
    tpu.vector_store %arg8[%c0_11, %c0_12], %37 {strides = array<i32>} : memref<8x128xf32, #tpu.memory_space<vmem>>, vector<8x128xf32>,
    %c0_13 = arith.constant 0 : index
    %c0_14 = arith.constant 0 : index
    %39 = vector.load %arg9[%c0_13, %c0_14] : memref<8x128xf32, #tpu.memory_space<vmem>>, vector<8x128xf32>
    %40 = vector.extract_strided_slice %17 {offsets = [0, 0], sizes = [8, 128], strides = [1, 1]} : vector<8x1152xf32> to vector<8x128xf32>
    %41 = vector.extract_strided_slice %17 {offsets = [0, 128], sizes = [8, 128], strides = [1, 1]} : vector<8x1152xf32> to vector<8x128xf32>
    %42 = arith.addf %40, %41 : vector<8x128xf32>
    %43 = vector.extract_strided_slice %17 {offsets = [0, 256], sizes = [8, 128], strides = [1, 1]} : vector<8x1152xf32> to vector<8x128xf32>
    %44 = arith.addf %42, %43 : vector<8x128xf32>
    %45 = vector.extract_strided_slice %17 {offsets = [0, 384], sizes = [8, 128], strides = [1, 1]} : vector<8x1152xf32> to vector<8x128xf32>
    %46 = arith.addf %44, %45 : vector<8x128xf32>
    %47 = vector.extract_strided_slice %17 {offsets = [0, 512], sizes = [8, 128], strides = [1, 1]} : vector<8x1152xf32> to vector<8x128xf32>
    %48 = arith.addf %46, %47 : vector<8x128xf32>
    %49 = vector.extract_strided_slice %17 {offsets = [0, 640], sizes = [8, 128], strides = [1, 1]} : vector<8x1152xf32> to vector<8x128xf32>
    %50 = arith.addf %48, %49 : vector<8x128xf32>
    %51 = vector.extract_strided_slice %17 {offsets = [0, 768], sizes = [8, 128], strides = [1, 1]} : vector<8x1152xf32> to vector<8x128xf32>
    %52 = arith.addf %50, %51 : vector<8x128xf32>
    %53 = vector.extract_strided_slice %17 {offsets = [0, 896], sizes = [8, 128], strides = [1, 1]} : vector<8x1152xf32> to vector<8x128xf32>
    %54 = arith.addf %52, %53 : vector<8x128xf32>
    %55 = vector.extract_strided_slice %17 {offsets = [0, 1024], sizes = [8, 128], strides = [1, 1]} : vector<8x1152xf32> to vector<8x128xf32>
    %56 = arith.addf %54, %55 : vector<8x128xf32>
    %57 = arith.addf %39, %56 : vector<8x128xf32>
    %c0_15 = arith.constant 0 : index
    %c0_16 = arith.constant 0 : index
    %58 = vector.load %arg9[%c0_15, %c0_16] : memref<8x128xf32, #tpu.memory_space<vmem>>, vector<8x128xf32>
    tpu.vector_store %arg9[%c0_15, %c0_16], %57 {strides = array<i32>} : memref<8x128xf32, #tpu.memory_space<vmem>>, vector<8x128xf32>,
    %c0_17 = arith.constant 0 : index
    %c0_18 = arith.constant 0 : index
    %59 = vector.load %arg10[%c0_17, %c0_18] : memref<8x128xf32, #tpu.memory_space<vmem>>, vector<8x128xf32>
    %60 = vector.extract_strided_slice %13 {offsets = [0, 0], sizes = [8, 128], strides = [1, 1]} : vector<8x1152xf32> to vector<8x128xf32>
    %61 = vector.extract_strided_slice %13 {offsets = [0, 128], sizes = [8, 128], strides = [1, 1]} : vector<8x1152xf32> to vector<8x128xf32>
    %62 = arith.addf %60, %61 : vector<8x128xf32>
    %63 = vector.extract_strided_slice %13 {offsets = [0, 256], sizes = [8, 128], strides = [1, 1]} : vector<8x1152xf32> to vector<8x128xf32>
    %64 = arith.addf %62, %63 : vector<8x128xf32>
    %65 = vector.extract_strided_slice %13 {offsets = [0, 384], sizes = [8, 128], strides = [1, 1]} : vector<8x1152xf32> to vector<8x128xf32>
    %66 = arith.addf %64, %65 : vector<8x128xf32>
    %67 = vector.extract_strided_slice %13 {offsets = [0, 512], sizes = [8, 128], strides = [1, 1]} : vector<8x1152xf32> to vector<8x128xf32>
    %68 = arith.addf %66, %67 : vector<8x128xf32>
    %69 = vector.extract_strided_slice %13 {offsets = [0, 640], sizes = [8, 128], strides = [1, 1]} : vector<8x1152xf32> to vector<8x128xf32>
    %70 = arith.addf %68, %69 : vector<8x128xf32>
    %71 = vector.extract_strided_slice %13 {offsets = [0, 768], sizes = [8, 128], strides = [1, 1]} : vector<8x1152xf32> to vector<8x128xf32>
    %72 = arith.addf %70, %71 : vector<8x128xf32>
    %73 = vector.extract_strided_slice %13 {offsets = [0, 896], sizes = [8, 128], strides = [1, 1]} : vector<8x1152xf32> to vector<8x128xf32>
    %74 = arith.addf %72, %73 : vector<8x128xf32>
    %75 = vector.extract_strided_slice %13 {offsets = [0, 1024], sizes = [8, 128], strides = [1, 1]} : vector<8x1152xf32> to vector<8x128xf32>
    %76 = arith.addf %74, %75 : vector<8x128xf32>
    %77 = arith.addf %59, %76 : vector<8x128xf32>
    %c0_19 = arith.constant 0 : index
    %c0_20 = arith.constant 0 : index
    %78 = vector.load %arg10[%c0_19, %c0_20] : memref<8x128xf32, #tpu.memory_space<vmem>>, vector<8x128xf32>
    tpu.vector_store %arg10[%c0_19, %c0_20], %77 {strides = array<i32>} : memref<8x128xf32, #tpu.memory_space<vmem>>, vector<8x128xf32>,
    %cst_21 = arith.constant -1.000000e+00 : f32
    %79 = vector.broadcast %cst_21 : f32 to vector<8x1152xf32>
    %80 = arith.select %15, %79, %13 : vector<8x1152xi1>, vector<8x1152xf32>
    %c0_22 = arith.constant 0 : index
    %81 = arith.index_cast %6 : i32 to index
    %82 = vector.load %arg14[%c0_22, %81] : memref<8x1152xf32, #tpu.memory_space<vmem>>, vector<8x1152xf32>
    tpu.vector_store %arg14[%c0_22, %81], %80 {strides = array<i32>} : memref<8x1152xf32, #tpu.memory_space<vmem>>, vector<8x1152xf32>,
    %c0_23 = arith.constant 0 : index
    %c0_24 = arith.constant 0 : index
    %c0_25 = arith.constant 0 : index
    %83 = vector.load %arg3[%c0_23, %c0_24, %c0_25] : memref<1x8x1152xf32, #tpu.memory_space<vmem>>, vector<1x8x1152xf32>
    %84 = vector.shape_cast %83 : vector<1x8x1152xf32> to vector<8x1152xf32>
    %c0_26 = arith.constant 0 : index
    %c0_27 = arith.constant 0 : index
    %c0_28 = arith.constant 0 : index
    %85 = vector.load %arg5[%c0_26, %c0_27, %c0_28] : memref<1x8x1152xf32, #tpu.memory_space<vmem>>, vector<1x8x1152xf32>
    %86 = vector.shape_cast %85 : vector<1x8x1152xf32> to vector<8x1152xf32>
    %87 = arith.subf %86, %84 : vector<8x1152xf32>
    %88 = arith.mulf %87, %87 : vector<8x1152xf32>
    %89 = arith.mulf %88, %4 : vector<8x1152xf32>
    %cst_29 = arith.constant 1.000000e-01 : f32
    %90 = vector.broadcast %cst_29 : f32 to vector<8x1152xf32>
    %91 = arith.cmpf oge, %84, %90 : vector<8x1152xf32>
    %92 = arith.extui %91 : vector<8x1152xi1> to vector<8x1152xi32>
    %93 = arith.sitofp %92 : vector<8x1152xi32> to vector<8x1152xf32>
    %c0_30 = arith.constant 0 : index
    %c0_31 = arith.constant 0 : index
    %94 = vector.load %arg11[%c0_30, %c0_31] : memref<8x128xf32, #tpu.memory_space<vmem>>, vector<8x128xf32>
    %95 = arith.mulf %89, %93 : vector<8x1152xf32>
    %96 = vector.extract_strided_slice %95 {offsets = [0, 0], sizes = [8, 128], strides = [1, 1]} : vector<8x1152xf32> to vector<8x128xf32>
    %97 = vector.extract_strided_slice %95 {offsets = [0, 128], sizes = [8, 128], strides = [1, 1]} : vector<8x1152xf32> to vector<8x128xf32>
    %98 = arith.addf %96, %97 : vector<8x128xf32>
    %99 = vector.extract_strided_slice %95 {offsets = [0, 256], sizes = [8, 128], strides = [1, 1]} : vector<8x1152xf32> to vector<8x128xf32>
    %100 = arith.addf %98, %99 : vector<8x128xf32>
    %101 = vector.extract_strided_slice %95 {offsets = [0, 384], sizes = [8, 128], strides = [1, 1]} : vector<8x1152xf32> to vector<8x128xf32>
    %102 = arith.addf %100, %101 : vector<8x128xf32>
    %103 = vector.extract_strided_slice %95 {offsets = [0, 512], sizes = [8, 128], strides = [1, 1]} : vector<8x1152xf32> to vector<8x128xf32>
    %104 = arith.addf %102, %103 : vector<8x128xf32>
    %105 = vector.extract_strided_slice %95 {offsets = [0, 640], sizes = [8, 128], strides = [1, 1]} : vector<8x1152xf32> to vector<8x128xf32>
    %106 = arith.addf %104, %105 : vector<8x128xf32>
    %107 = vector.extract_strided_slice %95 {offsets = [0, 768], sizes = [8, 128], strides = [1, 1]} : vector<8x1152xf32> to vector<8x128xf32>
    %108 = arith.addf %106, %107 : vector<8x128xf32>
    %109 = vector.extract_strided_slice %95 {offsets = [0, 896], sizes = [8, 128], strides = [1, 1]} : vector<8x1152xf32> to vector<8x128xf32>
    %110 = arith.addf %108, %109 : vector<8x128xf32>
    %111 = vector.extract_strided_slice %95 {offsets = [0, 1024], sizes = [8, 128], strides = [1, 1]} : vector<8x1152xf32> to vector<8x128xf32>
    %112 = arith.addf %110, %111 : vector<8x128xf32>
    %113 = arith.addf %94, %112 : vector<8x128xf32>
    %c0_32 = arith.constant 0 : index
    %c0_33 = arith.constant 0 : index
    %114 = vector.load %arg11[%c0_32, %c0_33] : memref<8x128xf32, #tpu.memory_space<vmem>>, vector<8x128xf32>
    tpu.vector_store %arg11[%c0_32, %c0_33], %113 {strides = array<i32>} : memref<8x128xf32, #tpu.memory_space<vmem>>, vector<8x128xf32>,
    %c0_34 = arith.constant 0 : index
    %c0_35 = arith.constant 0 : index
    %115 = vector.load %arg12[%c0_34, %c0_35] : memref<8x128xf32, #tpu.memory_space<vmem>>, vector<8x128xf32>
    %116 = vector.extract_strided_slice %93 {offsets = [0, 0], sizes = [8, 128], strides = [1, 1]} : vector<8x1152xf32> to vector<8x128xf32>
    %117 = vector.extract_strided_slice %93 {offsets = [0, 128], sizes = [8, 128], strides = [1, 1]} : vector<8x1152xf32> to vector<8x128xf32>
    %118 = arith.addf %116, %117 : vector<8x128xf32>
    %119 = vector.extract_strided_slice %93 {offsets = [0, 256], sizes = [8, 128], strides = [1, 1]} : vector<8x1152xf32> to vector<8x128xf32>
    %120 = arith.addf %118, %119 : vector<8x128xf32>
    %121 = vector.extract_strided_slice %93 {offsets = [0, 384], sizes = [8, 128], strides = [1, 1]} : vector<8x1152xf32> to vector<8x128xf32>
    %122 = arith.addf %120, %121 : vector<8x128xf32>
    %123 = vector.extract_strided_slice %93 {offsets = [0, 512], sizes = [8, 128], strides = [1, 1]} : vector<8x1152xf32> to vector<8x128xf32>
    %124 = arith.addf %122, %123 : vector<8x128xf32>
    %125 = vector.extract_strided_slice %93 {offsets = [0, 640], sizes = [8, 128], strides = [1, 1]} : vector<8x1152xf32> to vector<8x128xf32>
    %126 = arith.addf %124, %125 : vector<8x128xf32>
    %127 = vector.extract_strided_slice %93 {offsets = [0, 768], sizes = [8, 128], strides = [1, 1]} : vector<8x1152xf32> to vector<8x128xf32>
    %128 = arith.addf %126, %127 : vector<8x128xf32>
    %129 = vector.extract_strided_slice %93 {offsets = [0, 896], sizes = [8, 128], strides = [1, 1]} : vector<8x1152xf32> to vector<8x128xf32>
    %130 = arith.addf %128, %129 : vector<8x128xf32>
    %131 = vector.extract_strided_slice %93 {offsets = [0, 1024], sizes = [8, 128], strides = [1, 1]} : vector<8x1152xf32> to vector<8x128xf32>
    %132 = arith.addf %130, %131 : vector<8x128xf32>
    %133 = arith.addf %115, %132 : vector<8x128xf32>
    %c0_36 = arith.constant 0 : index
    %c0_37 = arith.constant 0 : index
    %134 = vector.load %arg12[%c0_36, %c0_37] : memref<8x128xf32, #tpu.memory_space<vmem>>, vector<8x128xf32>
    tpu.vector_store %arg12[%c0_36, %c0_37], %133 {strides = array<i32>} : memref<8x128xf32, #tpu.memory_space<vmem>>, vector<8x128xf32>,
    %c0_38 = arith.constant 0 : index
    %c0_39 = arith.constant 0 : index
    %135 = vector.load %arg13[%c0_38, %c0_39] : memref<8x128xf32, #tpu.memory_space<vmem>>, vector<8x128xf32>
    %136 = vector.extract_strided_slice %89 {offsets = [0, 0], sizes = [8, 128], strides = [1, 1]} : vector<8x1152xf32> to vector<8x128xf32>
    %137 = vector.extract_strided_slice %89 {offsets = [0, 128], sizes = [8, 128], strides = [1, 1]} : vector<8x1152xf32> to vector<8x128xf32>
    %138 = arith.addf %136, %137 : vector<8x128xf32>
    %139 = vector.extract_strided_slice %89 {offsets = [0, 256], sizes = [8, 128], strides = [1, 1]} : vector<8x1152xf32> to vector<8x128xf32>
    %140 = arith.addf %138, %139 : vector<8x128xf32>
    %141 = vector.extract_strided_slice %89 {offsets = [0, 384], sizes = [8, 128], strides = [1, 1]} : vector<8x1152xf32> to vector<8x128xf32>
    %142 = arith.addf %140, %141 : vector<8x128xf32>
    %143 = vector.extract_strided_slice %89 {offsets = [0, 512], sizes = [8, 128], strides = [1, 1]} : vector<8x1152xf32> to vector<8x128xf32>
    %144 = arith.addf %142, %143 : vector<8x128xf32>
    %145 = vector.extract_strided_slice %89 {offsets = [0, 640], sizes = [8, 128], strides = [1, 1]} : vector<8x1152xf32> to vector<8x128xf32>
    %146 = arith.addf %144, %145 : vector<8x128xf32>
    %147 = vector.extract_strided_slice %89 {offsets = [0, 768], sizes = [8, 128], strides = [1, 1]} : vector<8x1152xf32> to vector<8x128xf32>
    %148 = arith.addf %146, %147 : vector<8x128xf32>
    %149 = vector.extract_strided_slice %89 {offsets = [0, 896], sizes = [8, 128], strides = [1, 1]} : vector<8x1152xf32> to vector<8x128xf32>
    %150 = arith.addf %148, %149 : vector<8x128xf32>
    %151 = vector.extract_strided_slice %89 {offsets = [0, 1024], sizes = [8, 128], strides = [1, 1]} : vector<8x1152xf32> to vector<8x128xf32>
    %152 = arith.addf %150, %151 : vector<8x128xf32>
    %153 = arith.addf %135, %152 : vector<8x128xf32>
    %c0_40 = arith.constant 0 : index
    %c0_41 = arith.constant 0 : index
    %154 = vector.load %arg13[%c0_40, %c0_41] : memref<8x128xf32, #tpu.memory_space<vmem>>, vector<8x128xf32>
    tpu.vector_store %arg13[%c0_40, %c0_41], %153 {strides = array<i32>} : memref<8x128xf32, #tpu.memory_space<vmem>>, vector<8x128xf32>,
    %cst_42 = arith.constant -1.000000e+00 : f32
    %155 = vector.broadcast %cst_42 : f32 to vector<8x1152xf32>
    %156 = arith.select %91, %155, %89 : vector<8x1152xi1>, vector<8x1152xf32>
    %c0_43 = arith.constant 0 : index
    %157 = arith.index_cast %6 : i32 to index
    %158 = vector.load %arg15[%c0_43, %157] : memref<8x1152xf32, #tpu.memory_space<vmem>>, vector<8x1152xf32>
    tpu.vector_store %arg15[%c0_43, %157], %156 {strides = array<i32>} : memref<8x1152xf32, #tpu.memory_space<vmem>>, vector<8x1152xf32>,
    %c0_i32_44 = arith.constant 0 : i32
    %159 = arith.cmpi eq, %arg1, %c0_i32_44 : i32
    %160 = arith.extui %159 : i1 to i32
    %c0_i32_45 = arith.constant 0 : i32
    %161 = arith.cmpi ne, %160, %c0_i32_45 : i32
    scf.if %161 {
      %c0_46 = arith.constant 0 : index
      %c0_47 = arith.constant 0 : index
      %162 = vector.load %arg8[%c0_46, %c0_47] : memref<8x128xf32, #tpu.memory_space<vmem>>, vector<8x128xf32>
      %cst_48 = arith.constant dense<0.000000e+00> : vector<8xf32>
      %163 = vector.multi_reduction <add>, %162, %cst_48 [1] : vector<8x128xf32> to vector<8xf32>
      %164 = vector.shape_cast %163 : vector<8xf32> to vector<8x1xf32>
      %cst_49 = arith.constant dense<0.000000e+00> : vector<1xf32>
      %165 = vector.multi_reduction <add>, %164, %cst_49 [0] : vector<8x1xf32> to vector<1xf32>
      %166 = vector.shape_cast %165 : vector<1xf32> to vector<1x1xf32>
      %c0_50 = arith.constant 0 : index
      %c0_51 = arith.constant 0 : index
      %167 = vector.load %arg9[%c0_50, %c0_51] : memref<8x128xf32, #tpu.memory_space<vmem>>, vector<8x128xf32>
      %cst_52 = arith.constant dense<0.000000e+00> : vector<8xf32>
      %168 = vector.multi_reduction <add>, %167, %cst_52 [1] : vector<8x128xf32> to vector<8xf32>
      %169 = vector.shape_cast %168 : vector<8xf32> to vector<8x1xf32>
      %cst_53 = arith.constant dense<0.000000e+00> : vector<1xf32>
      %170 = vector.multi_reduction <add>, %169, %cst_53 [0] : vector<8x1xf32> to vector<1xf32>
      %171 = vector.shape_cast %170 : vector<1xf32> to vector<1x1xf32>
      %c0_54 = arith.constant 0 : index
      %c0_55 = arith.constant 0 : index
      %172 = vector.load %arg10[%c0_54, %c0_55] : memref<8x128xf32, #tpu.memory_space<vmem>>, vector<8x128xf32>
      %cst_56 = arith.constant dense<0.000000e+00> : vector<8xf32>
      %173 = vector.multi_reduction <add>, %172, %cst_56 [1] : vector<8x128xf32> to vector<8xf32>
      %174 = vector.shape_cast %173 : vector<8xf32> to vector<8x1xf32>
      %cst_57 = arith.constant dense<0.000000e+00> : vector<1xf32>
      %175 = vector.multi_reduction <add>, %174, %cst_57 [0] : vector<8x1xf32> to vector<1xf32>
      %176 = vector.shape_cast %175 : vector<1xf32> to vector<1x1xf32>
      %c0_58 = arith.constant 0 : index
      %c0_59 = arith.constant 0 : index
      %177 = vector.load %arg11[%c0_58, %c0_59] : memref<8x128xf32, #tpu.memory_space<vmem>>, vector<8x128xf32>
      %cst_60 = arith.constant dense<0.000000e+00> : vector<8xf32>
      %178 = vector.multi_reduction <add>, %177, %cst_60 [1] : vector<8x128xf32> to vector<8xf32>
      %179 = vector.shape_cast %178 : vector<8xf32> to vector<8x1xf32>
      %cst_61 = arith.constant dense<0.000000e+00> : vector<1xf32>
      %180 = vector.multi_reduction <add>, %179, %cst_61 [0] : vector<8x1xf32> to vector<1xf32>
      %181 = vector.shape_cast %180 : vector<1xf32> to vector<1x1xf32>
      %c0_62 = arith.constant 0 : index
      %c0_63 = arith.constant 0 : index
      %182 = vector.load %arg12[%c0_62, %c0_63] : memref<8x128xf32, #tpu.memory_space<vmem>>, vector<8x128xf32>
      %cst_64 = arith.constant dense<0.000000e+00> : vector<8xf32>
      %183 = vector.multi_reduction <add>, %182, %cst_64 [1] : vector<8x128xf32> to vector<8xf32>
      %184 = vector.shape_cast %183 : vector<8xf32> to vector<8x1xf32>
      %cst_65 = arith.constant dense<0.000000e+00> : vector<1xf32>
      %185 = vector.multi_reduction <add>, %184, %cst_65 [0] : vector<8x1xf32> to vector<1xf32>
      %186 = vector.shape_cast %185 : vector<1xf32> to vector<1x1xf32>
      %c0_66 = arith.constant 0 : index
      %c0_67 = arith.constant 0 : index
      %187 = vector.load %arg13[%c0_66, %c0_67] : memref<8x128xf32, #tpu.memory_space<vmem>>, vector<8x128xf32>
      %cst_68 = arith.constant dense<0.000000e+00> : vector<8xf32>
      %188 = vector.multi_reduction <add>, %187, %cst_68 [1] : vector<8x128xf32> to vector<8xf32>
      %189 = vector.shape_cast %188 : vector<8xf32> to vector<8x1xf32>
      %cst_69 = arith.constant dense<0.000000e+00> : vector<1xf32>
      %190 = vector.multi_reduction <add>, %189, %cst_69 [0] : vector<8x1xf32> to vector<1xf32>
      %191 = vector.shape_cast %190 : vector<1xf32> to vector<1x1xf32>
      %cst_70 = arith.constant 0.000000e+00 : f32
      %192 = vector.broadcast %cst_70 : f32 to vector<1x1xf32>
      %193 = arith.cmpf ogt, %171, %192 : vector<1x1xf32>
      %cst_71 = arith.constant 3.000000e+00 : f32
      %194 = vector.broadcast %cst_71 : f32 to vector<1x1xf32>
      %195 = arith.mulf %194, %171 : vector<1x1xf32>
      %cst_72 = arith.constant 5.000000e+02 : f32
      %196 = vector.broadcast %cst_72 : f32 to vector<1x1xf32>
      %197 = arith.select %193, %195, %196 : vector<1x1xi1>, vector<1x1xf32>
      %c0_73 = arith.constant 0 : index
      %c0_74 = arith.constant 0 : index
      %198 = vector.load %arg14[%c0_73, %c0_74] : memref<8x1152xf32, #tpu.memory_space<vmem>>, vector<8x1152xf32>
      %cst_75 = arith.constant dense<0xFF800000> : vector<8xf32>
      %199 = vector.multi_reduction <maximumf>, %198, %cst_75 [1] : vector<8x1152xf32> to vector<8xf32>
      %200 = vector.shape_cast %199 : vector<8xf32> to vector<8x1xf32>
      %cst_76 = arith.constant dense<0xFF800000> : vector<1xf32>
      %201 = vector.multi_reduction <maximumf>, %200, %cst_76 [0] : vector<8x1xf32> to vector<1xf32>
      %202 = vector.shape_cast %201 : vector<1xf32> to vector<1x1xf32>
      %cst_77 = arith.constant 0.000000e+00 : f32
      %203 = vector.broadcast %cst_77 : f32 to vector<1x1xf32>
      %204 = arith.maximumf %202, %203 : vector<1x1xf32>
      %cst_78 = arith.constant 1.00390625 : f32
      %205 = vector.broadcast %cst_78 : f32 to vector<1x1xf32>
      %206 = arith.mulf %204, %205 : vector<1x1xf32>
      %cst_79 = arith.constant 1.000000e-30 : f32
      %207 = vector.broadcast %cst_79 : f32 to vector<1x1xf32>
      %208 = arith.addf %206, %207 : vector<1x1xf32>
      %cst_80 = arith.constant 0.000000e+00 : f32
      %209 = vector.broadcast %cst_80 : f32 to vector<1x1xf32>
      %c0_i32_81 = arith.constant 0 : i32
      %c32_i32 = arith.constant 32 : i32
      %210 = arith.addi %c0_i32_81, %c32_i32 : i32
      %c1_i32 = arith.constant 1 : i32
      %211:2 = scf.for %arg16 = %c0_i32_81 to %210 step %c1_i32 iter_args(%arg17 = %209, %arg18 = %208) -> (vector<1x1xf32>, vector<1x1xf32>)  : i32 {
        %274 = arith.addf %arg17, %arg18 : vector<1x1xf32>
        %cst_117 = arith.constant 5.000000e-01 : f32
        %275 = vector.broadcast %cst_117 : f32 to vector<1x1xf32>
        %276 = arith.mulf %275, %274 : vector<1x1xf32>
        %c0_118 = arith.constant 0 : index
        %c0_119 = arith.constant 0 : index
        %277 = vector.load %arg14[%c0_118, %c0_119] : memref<8x1152xf32, #tpu.memory_space<vmem>>, vector<8x1152xf32>
        %278 = vector.broadcast %276 : vector<1x1xf32> to vector<8x1152xf32>
        %279 = arith.cmpf oge, %277, %278 : vector<8x1152xf32>
        %cst_120 = arith.constant 1.000000e+00 : f32
        %cst_121 = arith.constant 0.000000e+00 : f32
        %280 = vector.broadcast %cst_120 : f32 to vector<8x1152xf32>
        %281 = vector.broadcast %cst_121 : f32 to vector<8x1152xf32>
        %282 = arith.select %279, %280, %281 : vector<8x1152xi1>, vector<8x1152xf32>
        %cst_122 = arith.constant dense<0.000000e+00> : vector<8xf32>
        %283 = vector.multi_reduction <add>, %282, %cst_122 [1] : vector<8x1152xf32> to vector<8xf32>
        %284 = vector.shape_cast %283 : vector<8xf32> to vector<8x1xf32>
        %cst_123 = arith.constant dense<0.000000e+00> : vector<1xf32>
        %285 = vector.multi_reduction <add>, %284, %cst_123 [0] : vector<8x1xf32> to vector<1xf32>
        %286 = vector.shape_cast %285 : vector<1xf32> to vector<1x1xf32>
        %287 = arith.cmpf oge, %286, %197 : vector<1x1xf32>
        %288 = arith.select %287, %276, %arg17 : vector<1x1xi1>, vector<1x1xf32>
        %289 = arith.select %287, %arg18, %276 : vector<1x1xi1>, vector<1x1xf32>
        scf.yield %288, %289 : vector<1x1xf32>, vector<1x1xf32>
      }
      %c0_82 = arith.constant 0 : index
      %c0_83 = arith.constant 0 : index
      %212 = vector.load %arg14[%c0_82, %c0_83] : memref<8x1152xf32, #tpu.memory_space<vmem>>, vector<8x1152xf32>
      %213 = vector.broadcast %211#1 : vector<1x1xf32> to vector<8x1152xf32>
      %214 = arith.cmpf oge, %212, %213 : vector<8x1152xf32>
      %cst_84 = arith.constant 0.000000e+00 : f32
      %215 = vector.broadcast %cst_84 : f32 to vector<8x1152xf32>
      %216 = arith.select %214, %212, %215 : vector<8x1152xi1>, vector<8x1152xf32>
      %cst_85 = arith.constant dense<0.000000e+00> : vector<8xf32>
      %217 = vector.multi_reduction <add>, %216, %cst_85 [1] : vector<8x1152xf32> to vector<8xf32>
      %218 = vector.shape_cast %217 : vector<8xf32> to vector<8x1xf32>
      %cst_86 = arith.constant dense<0.000000e+00> : vector<1xf32>
      %219 = vector.multi_reduction <add>, %218, %cst_86 [0] : vector<8x1xf32> to vector<1xf32>
      %220 = vector.shape_cast %219 : vector<1xf32> to vector<1x1xf32>
      %cst_87 = arith.constant 1.000000e+00 : f32
      %cst_88 = arith.constant 0.000000e+00 : f32
      %221 = vector.broadcast %cst_87 : f32 to vector<8x1152xf32>
      %222 = vector.broadcast %cst_88 : f32 to vector<8x1152xf32>
      %223 = arith.select %214, %221, %222 : vector<8x1152xi1>, vector<8x1152xf32>
      %cst_89 = arith.constant dense<0.000000e+00> : vector<8xf32>
      %224 = vector.multi_reduction <add>, %223, %cst_89 [1] : vector<8x1152xf32> to vector<8xf32>
      %225 = vector.shape_cast %224 : vector<8xf32> to vector<8x1xf32>
      %cst_90 = arith.constant dense<0.000000e+00> : vector<1xf32>
      %226 = vector.multi_reduction <add>, %225, %cst_90 [0] : vector<8x1xf32> to vector<1xf32>
      %227 = vector.shape_cast %226 : vector<1xf32> to vector<1x1xf32>
      %228 = arith.subf %197, %227 : vector<1x1xf32>
      %229 = arith.mulf %228, %211#0 : vector<1x1xf32>
      %230 = arith.addf %220, %229 : vector<1x1xf32>
      %cst_91 = arith.constant 0.000000e+00 : f32
      %231 = vector.broadcast %cst_91 : f32 to vector<1x1xf32>
      %232 = arith.cmpf ogt, %186, %231 : vector<1x1xf32>
      %cst_92 = arith.constant 3.000000e+00 : f32
      %233 = vector.broadcast %cst_92 : f32 to vector<1x1xf32>
      %234 = arith.mulf %233, %186 : vector<1x1xf32>
      %cst_93 = arith.constant 5.000000e+02 : f32
      %235 = vector.broadcast %cst_93 : f32 to vector<1x1xf32>
      %236 = arith.select %232, %234, %235 : vector<1x1xi1>, vector<1x1xf32>
      %c0_94 = arith.constant 0 : index
      %c0_95 = arith.constant 0 : index
      %237 = vector.load %arg15[%c0_94, %c0_95] : memref<8x1152xf32, #tpu.memory_space<vmem>>, vector<8x1152xf32>
      %cst_96 = arith.constant dense<0xFF800000> : vector<8xf32>
      %238 = vector.multi_reduction <maximumf>, %237, %cst_96 [1] : vector<8x1152xf32> to vector<8xf32>
      %239 = vector.shape_cast %238 : vector<8xf32> to vector<8x1xf32>
      %cst_97 = arith.constant dense<0xFF800000> : vector<1xf32>
      %240 = vector.multi_reduction <maximumf>, %239, %cst_97 [0] : vector<8x1xf32> to vector<1xf32>
      %241 = vector.shape_cast %240 : vector<1xf32> to vector<1x1xf32>
      %cst_98 = arith.constant 0.000000e+00 : f32
      %242 = vector.broadcast %cst_98 : f32 to vector<1x1xf32>
      %243 = arith.maximumf %241, %242 : vector<1x1xf32>
      %cst_99 = arith.constant 1.00390625 : f32
      %244 = vector.broadcast %cst_99 : f32 to vector<1x1xf32>
      %245 = arith.mulf %243, %244 : vector<1x1xf32>
      %cst_100 = arith.constant 1.000000e-30 : f32
      %246 = vector.broadcast %cst_100 : f32 to vector<1x1xf32>
      %247 = arith.addf %245, %246 : vector<1x1xf32>
      %cst_101 = arith.constant 0.000000e+00 : f32
      %248 = vector.broadcast %cst_101 : f32 to vector<1x1xf32>
      %c0_i32_102 = arith.constant 0 : i32
      %c32_i32_103 = arith.constant 32 : i32
      %249 = arith.addi %c0_i32_102, %c32_i32_103 : i32
      %c1_i32_104 = arith.constant 1 : i32
      %250:2 = scf.for %arg16 = %c0_i32_102 to %249 step %c1_i32_104 iter_args(%arg17 = %248, %arg18 = %247) -> (vector<1x1xf32>, vector<1x1xf32>)  : i32 {
        %274 = arith.addf %arg17, %arg18 : vector<1x1xf32>
        %cst_117 = arith.constant 5.000000e-01 : f32
        %275 = vector.broadcast %cst_117 : f32 to vector<1x1xf32>
        %276 = arith.mulf %275, %274 : vector<1x1xf32>
        %c0_118 = arith.constant 0 : index
        %c0_119 = arith.constant 0 : index
        %277 = vector.load %arg15[%c0_118, %c0_119] : memref<8x1152xf32, #tpu.memory_space<vmem>>, vector<8x1152xf32>
        %278 = vector.broadcast %276 : vector<1x1xf32> to vector<8x1152xf32>
        %279 = arith.cmpf oge, %277, %278 : vector<8x1152xf32>
        %cst_120 = arith.constant 1.000000e+00 : f32
        %cst_121 = arith.constant 0.000000e+00 : f32
        %280 = vector.broadcast %cst_120 : f32 to vector<8x1152xf32>
        %281 = vector.broadcast %cst_121 : f32 to vector<8x1152xf32>
        %282 = arith.select %279, %280, %281 : vector<8x1152xi1>, vector<8x1152xf32>
        %cst_122 = arith.constant dense<0.000000e+00> : vector<8xf32>
        %283 = vector.multi_reduction <add>, %282, %cst_122 [1] : vector<8x1152xf32> to vector<8xf32>
        %284 = vector.shape_cast %283 : vector<8xf32> to vector<8x1xf32>
        %cst_123 = arith.constant dense<0.000000e+00> : vector<1xf32>
        %285 = vector.multi_reduction <add>, %284, %cst_123 [0] : vector<8x1xf32> to vector<1xf32>
        %286 = vector.shape_cast %285 : vector<1xf32> to vector<1x1xf32>
        %287 = arith.cmpf oge, %286, %236 : vector<1x1xf32>
        %288 = arith.select %287, %276, %arg17 : vector<1x1xi1>, vector<1x1xf32>
        %289 = arith.select %287, %arg18, %276 : vector<1x1xi1>, vector<1x1xf32>
        scf.yield %288, %289 : vector<1x1xf32>, vector<1x1xf32>
      }
      %c0_105 = arith.constant 0 : index
      %c0_106 = arith.constant 0 : index
      %251 = vector.load %arg15[%c0_105, %c0_106] : memref<8x1152xf32, #tpu.memory_space<vmem>>, vector<8x1152xf32>
      %252 = vector.broadcast %250#1 : vector<1x1xf32> to vector<8x1152xf32>
      %253 = arith.cmpf oge, %251, %252 : vector<8x1152xf32>
      %cst_107 = arith.constant 0.000000e+00 : f32
      %254 = vector.broadcast %cst_107 : f32 to vector<8x1152xf32>
      %255 = arith.select %253, %251, %254 : vector<8x1152xi1>, vector<8x1152xf32>
      %cst_108 = arith.constant dense<0.000000e+00> : vector<8xf32>
      %256 = vector.multi_reduction <add>, %255, %cst_108 [1] : vector<8x1152xf32> to vector<8xf32>
      %257 = vector.shape_cast %256 : vector<8xf32> to vector<8x1xf32>
      %cst_109 = arith.constant dense<0.000000e+00> : vector<1xf32>
      %258 = vector.multi_reduction <add>, %257, %cst_109 [0] : vector<8x1xf32> to vector<1xf32>
      %259 = vector.shape_cast %258 : vector<1xf32> to vector<1x1xf32>
      %cst_110 = arith.constant 1.000000e+00 : f32
      %cst_111 = arith.constant 0.000000e+00 : f32
      %260 = vector.broadcast %cst_110 : f32 to vector<8x1152xf32>
      %261 = vector.broadcast %cst_111 : f32 to vector<8x1152xf32>
      %262 = arith.select %253, %260, %261 : vector<8x1152xi1>, vector<8x1152xf32>
      %cst_112 = arith.constant dense<0.000000e+00> : vector<8xf32>
      %263 = vector.multi_reduction <add>, %262, %cst_112 [1] : vector<8x1152xf32> to vector<8xf32>
      %264 = vector.shape_cast %263 : vector<8xf32> to vector<8x1xf32>
      %cst_113 = arith.constant dense<0.000000e+00> : vector<1xf32>
      %265 = vector.multi_reduction <add>, %264, %cst_113 [0] : vector<8x1xf32> to vector<1xf32>
      %266 = vector.shape_cast %265 : vector<1xf32> to vector<1x1xf32>
      %267 = arith.subf %236, %266 : vector<1x1xf32>
      %268 = arith.mulf %267, %250#0 : vector<1x1xf32>
      %269 = arith.addf %259, %268 : vector<1x1xf32>
      %270 = tpu.concatenate %166, %171, %176, %230, %181, %186, %191, %269 in 1 : vector<1x1xf32>, vector<1x1xf32>, vector<1x1xf32>, vector<1x1xf32>, vector<1x1xf32>, vector<1x1xf32>, vector<1x1xf32>, vector<1x1xf32> -> vector<1x8xf32>
      %c0_114 = arith.constant 0 : index
      %c0_115 = arith.constant 0 : index
      %c0_116 = arith.constant 0 : index
      %271 = vector.load %arg7[%c0_114, %c0_115, %c0_116] : memref<1x1x8xf32, #tpu.memory_space<vmem>>, vector<1x1x8xf32>
      %272 = vector.shape_cast %271 : vector<1x1x8xf32> to vector<1x8xf32>
      %273 = vector.shape_cast %270 : vector<1x8xf32> to vector<1x1x8xf32>
      tpu.vector_store %arg7[%c0_114, %c0_115, %c0_116], %273 {strides = array<i32>} : memref<1x1x8xf32, #tpu.memory_space<vmem>>, vector<1x1x8xf32>,
    } else {
    }
    return
  }
  func.func @transform_0(%arg0: i32, %arg1: i32) -> (i32, i32, i32) {
    %c0_i32 = arith.constant 0 : i32
    %c0_i32_0 = arith.constant 0 : i32
    return %arg0, %c0_i32, %arg1 : i32, i32, i32
  }
  func.func @transform_1(%arg0: i32, %arg1: i32) -> (i32, i32, i32) {
    %c0_i32 = arith.constant 0 : i32
    %c0_i32_0 = arith.constant 0 : i32
    return %arg0, %c0_i32, %arg1 : i32, i32, i32
  }
  func.func @transform_2(%arg0: i32, %arg1: i32) -> (i32, i32, i32) {
    %c0_i32 = arith.constant 0 : i32
    %c0_i32_0 = arith.constant 0 : i32
    return %arg0, %c0_i32, %arg1 : i32, i32, i32
  }
  func.func @transform_3(%arg0: i32, %arg1: i32) -> (i32, i32, i32) {
    %c0_i32 = arith.constant 0 : i32
    %c0_i32_0 = arith.constant 0 : i32
    return %arg0, %c0_i32, %arg1 : i32, i32, i32
  }
  func.func @transform_4(%arg0: i32, %arg1: i32) -> (i32, i32, i32) {
    %c0_i32 = arith.constant 0 : i32
    %c0_i32_0 = arith.constant 0 : i32
    return %arg0, %c0_i32, %arg1 : i32, i32, i32
  }
  func.func @transform_5(%arg0: i32, %arg1: i32) -> (i32, i32, i32) {
    %c0_i32 = arith.constant 0 : i32
    %c0_i32_0 = arith.constant 0 : i32
    %c0_i32_1 = arith.constant 0 : i32
    return %arg0, %c0_i32, %c0_i32_0 : i32, i32, i32
  }
}

</mosaic_0001>

<bundles_post_ra>
// kernel: tpu_custom_call.1
= control target key start
LH: loop header
LB: loop body
LE: loop exit
PB: predicated region body
PF: predicated region fallthrough
CT: control target
= control target key end

     0   :  { %s2651_s0 = inlined_call_operand.hbm [shape: f32[2,8,1152], index: 0, kind: input, shape index: {}]   ;;  %s2652_s1 = inlined_call_operand.hbm [shape: f32[2,8,1152], index: 1, kind: input, shape index: {}]   ;;  %s2653_s2 = inlined_call_operand.hbm [shape: f32[2,8,1152], index: 2, kind: input, shape index: {}]   ;;  %s2654_s3 = inlined_call_operand.hbm [shape: f32[2,8,1152], index: 3, kind: input, shape index: {}]   ;;  %s2655_s4 = inlined_call_operand.hbm [shape: f32[2,8,1152], index: 4, kind: input, shape index: {}]   ;;  %s2656_s5 = inlined_call_operand.hbm [shape: f32[2,1,8], index: 5, kind: output, shape index: {}]  }
   0x1   :  { %2671 = sst [smem:[#allocation28_spill]] %s2652_s1 }
   0x2   :  { %2672 = sst [smem:[#allocation29_spill]] %s2654_s3 }
   0x3   :  { %10 = vsyncpa [#allocation11], 0 }
   0x4   :  { %12 = vsyncpa [#allocation11 + $0x1], 0 }
   0x5   :  { %13 = vsyncpa [#allocation14], 0 }
   0x6   :  { %15 = vsyncpa [#allocation14 + $0x1], 0 }
   0x7   :  { %16 = vsyncpa [#allocation17], 0 }
   0x8   :  { %18 = vsyncpa [#allocation17 + $0x1], 0 }
   0x9   :  { %19 = vsyncpa [#allocation12], 0 }
   0xa   :  { %21 = vsyncpa [#allocation12 + $0x1], 0  ;;  %s1802_s18 = smov 0   ;;  %s1804_s19 = smov 0  }
   0xb   :  { %s1806_s20 = smov 0   ;;  %s1808_s21 = smov 0  }
   0xc   :  { %s1810_s22 = smov 0   ;;  %s1812_s23 = smov 0  }
   0xd LB: > { %2673 = sst [smem:[#allocation24_spill]] %s1733_s22  ;;  %s1833_s24 = sadd.s32 4294967295, %s1737_s23   ;;  %s1737_s23 = sphi %s1812_s23, %s27_s23   ;;  %s1733_s22 = sphi %s1810_s22, %s2711_s22   ;;  %s1729_s21 = sphi %s1808_s21, %s2710_s21   ;;  %s1725_s20 = sphi %s1806_s20, %s2714_s20   ;;  %s1721_s19 = sphi %s1804_s19, %s2713_s19   ;;  %s1717_s18 = sphi %s1802_s18, %s2712_s18  }
   0xe   : > { %2674 = sst [smem:[#allocation25_spill]] %s1737_s23  ;;  %s1299_s25 = sadd.s32 4294967294, %s1737_s23  }
   0xf   : > { %s39_s26 = sadd.s32 1, %s1733_s22  ;;  %s48_s27 = sadd.s32 1, %s1725_s20 }
  0x10   : > { %p41_p0 = scmp.ge.s32.totalorder %s39_s26, 2  ;;  %p55_p1 = scmp.ne.s32.totalorder %s1725_s20, %s1721_s19 }
  0x11   : > { %p56_p2 = scmp.eq.s32.totalorder %s1737_s23, 0  ;;  %p61_p3 = scmp.ne.s32.totalorder %s1721_s19, %s1717_s18 }
  0x12   : > { %s2716_s26 = smov (%p41_p0, %s39_s26), 0  ;;  %p62_p5 = scmp.eq.s32.totalorder %s1833_s24, 0 }
  0x13   : > { %2675 = sst [smem:[#allocation26_spill]] %s2716_s26  ;;  %p1845_p4 = por %p56_p2, %p55_p1 }
  0x14   : > { %s43_s29 = ssub.s32 %s1733_s22, %s2716_s26  ;;  %p197_p6 = scmp.eq.s32.totalorder %s1833_s24, 1 }
  0x15   : > { %p46_p7 = scmp.eq.s32.totalorder %s43_s29, 0  ;;  %p1853_p8 = por %p62_p5, %p61_p3 }
  0x16   : > { %p1857_p9 = por %p197_p6, %p55_p1  ;;  %p203_p10 = scmp.eq.s32.totalorder %s1299_s25, 1 }
  0x17   : > { %s2677_s30 = scalar_select %p1853_p8, 1, 0 }
  0x18   : > { %s2678_s6 = scalar_select %p1857_p9, 1, 0 }
  0x19   : > { %s1862_s7 = scalar_select %p46_p7, %s1725_s20, %s48_s27  }
  0x1a   : > { %p1864_p11 = por %p203_p10, %p61_p3  ;;  %p1372_p13 = scmp.lt.s32.totalorder %s1737_s23, 2 }
  0x1b   : > { %2679 = sst [smem:[#allocation27_spill]] %s1862_s7  ;;  %s2657_s9 = sand.u32 1, %s1725_s20  }
  0x1c   : > { %s2680_s8 = scalar_select %p1864_p11, 1, 0 }
  0x1d   : > { %s1873_s10 = smul.u32 72, %s2657_s9  ;;  %s2659_s11 = sand.u32 1, %s1737_s23  }
  0x1e   : > { %s1877_s12 = smul.u32 1152, %s1733_s22  ;;  %p1881_p0 = pnand %p1372_p13, %p1845_p4 }
  0x1f   : > { %s2682_s1 = sld [smem:[#allocation28_spill]]  ;;  %s248_s17 = scalar_lea.vmem [#allocation13], %s1873_s10 }
  0x20   : > { %s2681_s13 = scalar_select %p1881_p0, 1, 0 }
  0x21   : > { %s258_s25 = sshll.u32 %s248_s17, 4  ;;  %s1898_s27 = scalar_lea.sflag [#allocation14], %s2659_s11  ;;  %s1893_s25 = int_to_ptr.vmem [resolvable:$true] %s258_s25 }
  0x22   : > { %p1904_p4 = pneg %p1881_p0 }
  0x25   : > { %s1889_s16 = scalar_lea.hbm %s2682_s1, %s1877_s12  ;;  %s1478_s17 = scalar_lea.hbm %s2682_s1, 2304 }
  0x26   : > { %s1473_s28 = scalar_lea.hbm %s1889_s16, 1152  ;;  %p1479_p7 = scmp.lt.u32.totalorder %s1889_s16, %s2682_s1 }
  0x27   : > { %p1474_p3 = scmp.ne.s32.totalorder %s1889_s16, %s1473_s28  ;;  %p1480_p10 = scmp.lt.u32.totalorder %s1478_s17, %s1473_s28 }
  0x28   : > { %p1482_p12 = scmp.lt.u32.totalorder %s1473_s28, %s1889_s16 }
  0x29   : > { %p1476_p5 = pnand %p1904_p4, %p1474_p3  ;;  %p1481_p13 = por %p1480_p10, %p1479_p7 }
  0x2b   : > { %p1477_p6 = pneg %p1476_p5  ;;  %p1483_p1 = por %p1482_p12, %p1481_p13 }
  0x2d   : > { %p1484_p2 = pnand %p1483_p1, %p1477_p6 }
  0x2f   : > { %1487 = shalt.err (!%p1484_p2)
}
  0x30   : > { %s1488_s11 = scalar_lea.vmem %s1893_s25, 1152  ;;  %s1763_s14 = smov [#allocation13]  }
  0x31   : > { %p1489_p3 = scmp.ne.s32.totalorder %s1893_s25, %s1488_s11  ;;  %s1493_s15 = sshll.u32 %s1763_s14, 4  ;;  %s1494_s15 = int_to_ptr.vmem [resolvable:$false] %s1493_s15 }
  0x32   : > { %s1495_s26 = scalar_lea.vmem %s1494_s15, 2304  ;;  %p1496_p9 = scmp.lt.s32.totalorder %s1893_s25, %s1494_s15 }
  0x33   : > { %p1491_p5 = pnand %p1489_p3, %p1904_p4  ;;  %p1497_p8 = scmp.lt.s32.totalorder %s1495_s26, %s1488_s11 }
  0x35   : > { %p1492_p11 = pneg %p1491_p5  ;;  %p1498_p7 = por %p1497_p8, %p1496_p9 }
  0x37   : > { %p1499_p10 = pnand %p1498_p7, %p1492_p11 }
  0x39   : > { %1502 = shalt.err (!%p1499_p10)
}
  0x3a   : > { %1358 = dma.hbm_to_vmem [thread:$0]  (!%p1881_p0), %s1889_s16, 1152, %s1893_s25, %s1898_s27  }
  0x3b   : > { %p2684_p12 = scmp.lt.s32.totalorder %s1737_s23, 3  ;;  %p2685_p1 = scmp.ge.s32.totalorder %s1737_s23, 1 }
  0x3c   : > { %s2687_s3 = sld [smem:[#allocation29_spill]]  ;;  %s290_s14 = scalar_lea.vmem [#allocation16], %s1873_s10 }
  0x3d   : > { %p1932_p2 = pnand %p2685_p1, %p2684_p12  ;;  %s300_s15 = sshll.u32 %s290_s14, 4  ;;  %s301_s15 = int_to_ptr.vmem [resolvable:$true] %s300_s15 }
  0x3e   : > { %s2688_s26 = sand.u32 1, %s1737_s23  }
  0x3f   : > { %s2686_s9 = scalar_select %p1932_p2, 1, 0 }
  0x40   : > { %s1945_s16 = scalar_lea.sflag [#allocation17], %s2688_s26 }
  0x42   : > { %s1940_s17 = scalar_lea.hbm %s2687_s3, %s1877_s12  ;;  %s1508_s11 = scalar_lea.hbm %s2687_s3, 2304 }
  0x43   : > { %s1503_s25 = scalar_lea.hbm %s1940_s17, 1152  ;;  %p1509_p6 = scmp.lt.u32.totalorder %s1940_s17, %s2687_s3 }
  0x44   : > { %p1504_p8 = scmp.ne.s32.totalorder %s1940_s17, %s1503_s25  ;;  %p1510_p13 = scmp.lt.u32.totalorder %s1508_s11, %s1503_s25 }
  0x45   : > { %p1512_p5 = scmp.lt.u32.totalorder %s1503_s25, %s1940_s17 }
  0x46   : > { %p1506_p9 = pnand %p1504_p8, %p1904_p4  ;;  %p1511_p3 = por %p1510_p13, %p1509_p6 }
  0x48   : > { %p1507_p11 = pneg %p1506_p9  ;;  %p1513_p7 = por %p1512_p5, %p1511_p3 }
  0x4a   : > { %p1514_p10 = pnand %p1513_p7, %p1507_p11 }
  0x4c   : > { %1517 = shalt.err (!%p1514_p10)
}
  0x4d   : > { %s1518_s14 = scalar_lea.vmem %s301_s15, 1152  ;;  %s1764_s26 = smov [#allocation16]  }
  0x4e   : > { %p1519_p12 = scmp.ne.s32.totalorder %s301_s15, %s1518_s14  ;;  %s1523_s23 = sshll.u32 %s1764_s26, 4  ;;  %s1524_s23 = int_to_ptr.vmem [resolvable:$false] %s1523_s23 }
  0x4f   : > { %s1525_s1 = scalar_lea.vmem %s1524_s23, 2304  ;;  %p1526_p9 = scmp.lt.s32.totalorder %s301_s15, %s1524_s23 }
  0x50   : > { %p1521_p1 = pnand %p1519_p12, %p1904_p4  ;;  %p1527_p2 = scmp.lt.s32.totalorder %s1525_s1, %s1518_s14 }
  0x52   : > { %p1522_p8 = pneg %p1521_p1  ;;  %p1528_p0 = por %p1527_p2, %p1526_p9 }
  0x54   : > { %p1529_p6 = pnand %p1528_p0, %p1522_p8 }
  0x56   : > { %1532 = shalt.err (!%p1529_p6)
}
  0x57   : > { %p2689_p13 = scmp.ne.s32.totalorder %s2681_s13, 0  ;;  %s1969_s25 = scalar_lea.hbm %s2651_s0, %s1877_s12 }
  0x58   : > { %s227_s23 = scalar_lea.vmem [#allocation10], %s1873_s10  ;;  %s2690_s28 = sand.u32 1, %s1725_s20  }
  0x59   : > { %1364 = dma.hbm_to_vmem [thread:$0]  (!%p2689_p13), %s1940_s17, 1152, %s301_s15, %s1945_s16  }
  0x5a   : > { %s237_s11 = sshll.u32 %s227_s23, 4  ;;  %s224_s14 = scalar_lea.sflag [#allocation11], %s2690_s28  ;;  %s238_s11 = int_to_ptr.vmem [resolvable:$true] %s237_s11 }
  0x5b   : > { %s1533_s26 = scalar_lea.hbm %s1969_s25, 1152  ;;  %s1538_s1 = scalar_lea.hbm %s2651_s0, 2304 }
  0x5c   : > { %p1534_p0 = scmp.ne.s32.totalorder %s1969_s25, %s1533_s26  ;;  %p1539_p3 = scmp.lt.u32.totalorder %s1969_s25, %s2651_s0 }
  0x5d   : > { %p1540_p5 = scmp.lt.u32.totalorder %s1538_s1, %s1533_s26  ;;  %p1542_p10 = scmp.lt.u32.totalorder %s1533_s26, %s1969_s25 }
  0x5e   : > { %p1536_p2 = pnand %p1534_p0, %p1904_p4 }
  0x5f   : > { %p1541_p7 = por %p1540_p5, %p1539_p3 }
  0x60   : > { %p1537_p11 = pneg %p1536_p2 }
  0x61   : > { %p1543_p12 = por %p1542_p10, %p1541_p7 }
  0x63   : > { %p1544_p1 = pnand %p1543_p12, %p1537_p11 }
  0x65   : > { %1547 = shalt.err (!%p1544_p1)
}
  0x66   : > { %s1548_s23 = scalar_lea.vmem %s238_s11, 1152  ;;  %s1765_s28 = smov [#allocation10]  }
  0x67   : > { %p1549_p8 = scmp.ne.s32.totalorder %s238_s11, %s1548_s23  ;;  %s1553_s3 = sshll.u32 %s1765_s28, 4  ;;  %s1554_s3 = int_to_ptr.vmem [resolvable:$false] %s1553_s3 }
  0x68   : > { %s1555_s17 = scalar_lea.vmem %s1554_s3, 2304  ;;  %p1556_p0 = scmp.lt.s32.totalorder %s238_s11, %s1554_s3 }
  0x69   : > { %p1551_p9 = pnand %p1549_p8, %p1904_p4  ;;  %p1557_p2 = scmp.lt.s32.totalorder %s1555_s17, %s1548_s23 }
  0x6b   : > { %p1552_p6 = pneg %p1551_p9  ;;  %p1558_p13 = por %p1557_p2, %p1556_p0 }
  0x6d   : > { %p1559_p3 = pnand %p1558_p13, %p1552_p6 }
  0x6f   : > { %1562 = shalt.err (!%p1559_p3)
}
  0x70   : > { %p2691_p5 = scmp.ne.s32.totalorder %s2681_s13, 0  ;;  %s1995_s1 = scalar_lea.hbm %s2653_s2, %s1877_s12 }
  0x71   : > { %s269_s3 = scalar_lea.vmem [#allocation15], %s1873_s10  ;;  %s1563_s7 = scalar_lea.hbm %s1995_s1, 1152 }
  0x72   : > { %1355 = dma.hbm_to_vmem [thread:$0]  (!%p2691_p5), %s1969_s25, 1152, %s238_s11, %s224_s14  }
  0x73   : > { %s279_s22 = sshll.u32 %s269_s3, 4  ;;  %p1564_p13 = scmp.ne.s32.totalorder %s1995_s1, %s1563_s7  ;;  %s280_s22 = int_to_ptr.vmem [resolvable:$true] %s279_s22 }
  0x74   : > { %s1568_s25 = scalar_lea.hbm %s2653_s2, 2304  ;;  %p1569_p10 = scmp.lt.u32.totalorder %s1995_s1, %s2653_s2 }
  0x75   : > { %p1566_p11 = pnand %p1564_p13, %p1904_p4  ;;  %p1570_p12 = scmp.lt.u32.totalorder %s1568_s25, %s1563_s7 }
  0x76   : > { %p1572_p8 = scmp.lt.u32.totalorder %s1563_s7, %s1995_s1 }
  0x77   : > { %p1567_p7 = pneg %p1566_p11  ;;  %p1571_p1 = por %p1570_p12, %p1569_p10 }
  0x79   : > { %p1573_p9 = por %p1572_p8, %p1571_p1 }
  0x7b   : > { %p1574_p6 = pnand %p1573_p9, %p1567_p7 }
  0x7d   : > { %1577 = shalt.err (!%p1574_p6)
}
  0x7e   : > { %s1578_s17 = scalar_lea.vmem %s280_s22, 1152  ;;  %s1766_s26 = smov [#allocation15]  }
  0x7f   : > { %p1579_p0 = scmp.ne.s32.totalorder %s280_s22, %s1578_s17  ;;  %s1583_s15 = sshll.u32 %s1766_s26, 4  ;;  %s1584_s15 = int_to_ptr.vmem [resolvable:$false] %s1583_s15 }
  0x80   : > { %s1585_s3 = scalar_lea.vmem %s1584_s15, 2304  ;;  %p1586_p13 = scmp.lt.s32.totalorder %s280_s22, %s1584_s15 }
  0x81   : > { %p1581_p2 = pnand %p1579_p0, %p1904_p4  ;;  %p1587_p11 = scmp.lt.s32.totalorder %s1585_s3, %s1578_s17 }
  0x83   : > { %p1582_p3 = pneg %p1581_p2  ;;  %p1588_p5 = por %p1587_p11, %p1586_p13 }
  0x85   : > { %p1589_p10 = pnand %p1588_p5, %p1582_p3 }
  0x87   : > { %1592 = shalt.err (!%p1589_p10)
}
  0x88   : > { %p2692_p12 = scmp.ne.s32.totalorder %s2681_s13, 0  ;;  %s2020_s28 = scalar_lea.hbm %s2655_s4, %s1877_s12 }
  0x89   : > { %s311_s25 = scalar_lea.vmem [#allocation18], %s1873_s10  ;;  %s1593_s14 = scalar_lea.hbm %s2020_s28, 1152 }
  0x8a   : > { %1361 = dma.hbm_to_vmem [thread:$0]  (!%p2692_p12), %s1995_s1, 1152, %s280_s22, %s1898_s27  }
  0x8b   : > { %s321_s11 = sshll.u32 %s311_s25, 4  ;;  %p1594_p5 = scmp.ne.s32.totalorder %s2020_s28, %s1593_s14  ;;  %s322_s11 = int_to_ptr.vmem [resolvable:$true] %s321_s11 }
  0x8c   : > { %s1598_s27 = scalar_lea.hbm %s2655_s4, 2304  ;;  %p1599_p8 = scmp.lt.u32.totalorder %s2020_s28, %s2655_s4 }
  0x8d   : > { %p1596_p7 = pnand %p1594_p5, %p1904_p4  ;;  %p1600_p9 = scmp.lt.u32.totalorder %s1598_s27, %s1593_s14 }
  0x8e   : > { %p1602_p0 = scmp.lt.u32.totalorder %s1593_s14, %s2020_s28 }
  0x8f   : > { %p1597_p1 = pneg %p1596_p7  ;;  %p1601_p6 = por %p1600_p9, %p1599_p8 }
  0x91   : > { %p1603_p2 = por %p1602_p0, %p1601_p6 }
  0x93   : > { %p1604_p3 = pnand %p1603_p2, %p1597_p1 }
  0x95   : > { %1607 = shalt.err (!%p1604_p3)
}
  0x96   : > { %s1608_s10 = scalar_lea.vmem %s322_s11, 1152  ;;  %s1767_s12 = smov [#allocation18]  }
  0x97   : > { %p1609_p13 = scmp.ne.s32.totalorder %s322_s11, %s1608_s10  ;;  %s1613_s15 = sshll.u32 %s1767_s12, 4  ;;  %s1614_s15 = int_to_ptr.vmem [resolvable:$false] %s1613_s15 }
  0x98   : > { %s1615_s3 = scalar_lea.vmem %s1614_s15, 2304  ;;  %p1616_p5 = scmp.lt.s32.totalorder %s322_s11, %s1614_s15 }
  0x99   : > { %p1611_p11 = pnand %p1609_p13, %p1904_p4  ;;  %p1617_p7 = scmp.lt.s32.totalorder %s1615_s3, %s1608_s10 }
  0x9b   : > { %p1612_p10 = pneg %p1611_p11  ;;  %p1618_p12 = por %p1617_p7, %p1616_p5 }
  0x9d   : > { %p1619_p8 = pnand %p1618_p12, %p1612_p10 }
  0x9f   : > { %1622 = shalt.err (!%p1619_p8)
}
  0xa0   : > { %p2693_p9 = scmp.ne.s32.totalorder %s2681_s13, 0  ;;  %p2694_p1 = scmp.ne.s32.totalorder %s2686_s9, 0 }
  0xa1   : > { %s2044_s29 = sand.u32 (!%p2694_p1), 1, %s1721_s19   ;;  %p2695_p4 = scmp.ne.s32.totalorder (!%p2694_p1), %s2677_s30, 0 }
  0xa2   : > { %1367 = dma.hbm_to_vmem [thread:$0]  (!%p2693_p9), %s2020_s28, 1152, %s322_s11, %s1945_s16  }
  0xa3   : > { %330 = sbr.rel (%p2694_p1) target bundleno = 1121 (0x461), region = 40  ;;  %s333_s23 = scalar_lea.sflag (!%p2694_p1), [#allocation11], %s2044_s29 }
  0xa4   : > { %s2047_s7 = smul.u32 (!%p2694_p1), 72, %s2044_s29 }
  0xa6   : > { %s336_s25 = scalar_lea.vmem (!%p2694_p1), [#allocation10], %s2047_s7 }
  0xaa   : > { %1700 = dma.done.wait (%p2695_p4), %s333_s23, 1152  }
  0xab   : > { %1702 = vsyncadd (%p2695_p4), %s333_s23, 4294966144  ;;  %s341_s13 = sand.u32 1, %s1833_s24   ;;  %s2057_s16 = scalar_lea.vmem [#allocation13], %s2047_s7 }
  0xac   : > { %s342_s9 = scalar_lea.sflag [#allocation14], %s341_s13 }
  0xad   : > { %1704 = dma.done.wait (%p2695_p4), %s342_s9, 2304  }
  0xae   : > { %1706 = vsyncadd (%p2695_p4), %s342_s9, 4294964992  ;;  %s2064_s28 = scalar_lea.vmem [#allocation15], %s2047_s7  ;;  %s360_s11 = scalar_lea.sflag [#allocation17], %s341_s13 }
  0xaf   : > { %s2067_s14 = scalar_lea.vmem [#allocation16], %s2047_s7 }
  0xb0   : > { %1708 = dma.done.wait (%p2695_p4), %s360_s11, 2304  }
  0xb1   : > { %1710 = vsyncadd (%p2695_p4), %s360_s11, 4294964992  ;;  %v2073_v0 = vld [vmem:[%s336_s25] sm:$0xff]  ;;  %v2075_v1 = vld [vmem:[%s336_s25 + $0x8] sm:$0xff]  ;;  %v2667_v23 = vmov 0.0   ;;  %s372_s24 = scalar_lea.vmem [#allocation18], %s2047_s7  ;;  %s417_s30 = scalar_lea.vmem [#allocation19], %s2044_s29 }
  0xb2   : > { %v2077_v2 = vld [vmem:[%s336_s25 + $0x10] sm:$0xff]  ;;  %v2079_v3 = vld [vmem:[%s336_s25 + $0x18] sm:$0xff]  ;;  %v2081_v4 = vld [vmem:[%s336_s25 + $0x20] sm:$0xff]  ;;  %vm488_vm0 = vcmp.ge.f32.partialorder %v2073_v0, 0.1  ;;  %s2397_s17 = smov 0  }
  0xb3   : > { %v2083_v5 = vld [vmem:[%s336_s25 + $0x28] sm:$0xff]  ;;  %v2085_v6 = vld [vmem:[%s336_s25 + $0x30] sm:$0xff]  ;;  %v2087_v7 = vld [vmem:[%s336_s25 + $0x38] sm:$0xff]  ;;  %vm489_vm1 = vcmp.ge.f32.partialorder %v2075_v1, 0.1  ;;  %v1308_v24 = vsel %vm488_vm0, 1.0, %v2667_v23 }
  0xb4   : > { %v2090_v8 = vld [vmem:[%s336_s25 + $0x40] sm:$0xff]  ;;  %v453_v9 = vld [vmem:[%s2064_s28 + $0x8] sm:$0xff]  ;;  %v454_v10 = vld [vmem:[%s2064_s28 + $0x10] sm:$0xff]  ;;  %vm490_vm2 = vcmp.ge.f32.partialorder %v2077_v2, 0.1  ;;  %v1309_v25 = vsel %vm489_vm1, 1.0, %v2667_v23 }
  0xb5   : > { %v455_v11 = vld [vmem:[%s2064_s28 + $0x18] sm:$0xff]  ;;  %v456_v12 = vld [vmem:[%s2064_s28 + $0x20] sm:$0xff]  ;;  %v457_v13 = vld [vmem:[%s2064_s28 + $0x28] sm:$0xff]  ;;  %v462_v14 = vsub.f32 %v453_v9, %v2075_v1  ;;  %v463_v15 = vsub.f32 %v454_v10, %v2077_v2  ;;  %vm491_vm3 = vcmp.ge.f32.partialorder %v2079_v3, 0.1  ;;  %v1310_v28 = vsel %vm490_vm2, 1.0, %v2667_v23 }
  0xb6   : > { %v458_v16 = vld [vmem:[%s2064_s28 + $0x30] sm:$0xff]  ;;  %v459_v17 = vld [vmem:[%s2064_s28 + $0x38] sm:$0xff]  ;;  %v460_v18 = vld [vmem:[%s2064_s28 + $0x40] sm:$0xff]  ;;  %v464_v19 = vsub.f32 %v455_v11, %v2079_v3  ;;  %v465_v20 = vsub.f32 %v456_v12, %v2081_v4  ;;  %v466_v21 = vsub.f32 %v457_v13, %v2083_v5  ;;  %vm492_vm4 = vcmp.ge.f32.partialorder %v2081_v4, 0.1 }
  0xb7   : > { %v467_v22 = vsub.f32 %v458_v16, %v2085_v6  ;;  %v468_v26 = vsub.f32 %v459_v17, %v2087_v7  ;;  %v469_v27 = vsub.f32 %v460_v18, %v2090_v8  ;;  %v452_v29 = vld [vmem:[%s2064_s28] sm:$0xff]  ;;  %v471_v30 = vmul.f32 %v462_v14, %v462_v14  ;;  %v2133_v39 = vld [vmem:[%s372_s24 + $0x8] sm:$0xff]  ;;  %v2135_v40 = vld [vmem:[%s372_s24 + $0x10] sm:$0xff] }
  0xb8   : > { %v472_v31 = vmul.f32 %v463_v15, %v463_v15  ;;  %v473_v32 = vmul.f32 %v464_v19, %v464_v19  ;;  %v474_v33 = vmul.f32 %v465_v20, %v465_v20  ;;  %vm493_vm5 = vcmp.ge.f32.partialorder %v2083_v5, 0.1  ;;  %v2131_v38 = vld [vmem:[%s372_s24] sm:$0xff]  ;;  %v2139_v45 = vld [vmem:[%s372_s24 + $0x28] sm:$0xff]  ;;  %v2141_v46 = vld [vmem:[%s372_s24 + $0x30] sm:$0xff] }
  0xb9   : > { %vm494_vm6 = vcmp.ge.f32.partialorder %v2085_v6, 0.1  ;;  %v536_v34 = vadd.f32 %v1309_v25, %v1308_v24  ;;  %v475_v35 = vmul.f32 %v466_v21, %v466_v21  ;;  %v476_v36 = vmul.f32 %v467_v22, %v467_v22  ;;  %v2137_v41 = vld [vmem:[%s372_s24 + $0x20] sm:$0xff]  ;;  %v2143_v47 = vld [vmem:[%s372_s24 + $0x38] sm:$0xff]  ;;  %v2241_v6 = vld [vmem:[%s2057_s16] sm:$0xff] }
  0xba   : > { %vm495_vm7 = vcmp.ge.f32.partialorder %v2087_v7, 0.1  ;;  %v2128_v37 = vsel %vm491_vm3, 1.0, %v2667_v23  ;;  %v477_v42 = vmul.f32 %v468_v26, %v468_v26  ;;  %v478_v43 = vmul.f32 %v469_v27, %v469_v27  ;;  %v2158_v52 = vld [vmem:[%s372_s24 + $0x40] sm:$0xff]  ;;  %v2166_v55 = vld [vmem:[%s372_s24 + $0x18] sm:$0xff]  ;;  %v2259_v26 = vld [vmem:[%s2057_s16 + $0x18] sm:$0xff] }
  0xbb   : > { %v537_v44 = vadd.f32 %v1310_v28, %v536_v34  ;;  %v461_v48 = vsub.f32 %v452_v29, %v2073_v0  ;;  %vm496_vm8 = vcmp.ge.f32.partialorder %v2090_v8, 0.1  ;;  %v1312_v49 = vsel %vm492_vm4, 1.0, %v2667_v23  ;;  %v2244_v7 = vld [vmem:[%s2057_s16 + $0x8] sm:$0xff]  ;;  %v2262_v27 = vld [vmem:[%s2057_s16 + $0x20] sm:$0xff]  ;;  %v2273_v34 = vld [vmem:[%s2057_s16 + $0x30] sm:$0xff] }
  0xbc   : > { %v1313_v50 = vsel %vm493_vm5, 1.0, %v2667_v23  ;;  %v2156_v51 = vsel %vm494_vm6, 1.0, %v2667_v23  ;;  %v2163_v53 = vsel %vm495_vm7, 1.0, %v2667_v23  ;;  %v480_v57 = vmul.f32 %v471_v30, %v2133_v39 }
  0xbd   : > { %v538_v54 = vadd.f32 %v2128_v37, %v537_v44  ;;  %v470_v56 = vmul.f32 %v461_v48, %v461_v48  ;;  %v481_v58 = vmul.f32 %v472_v31, %v2135_v40  ;;  %v2171_v59 = vmul.f32 %v474_v33, %v2137_v41  ;;  %v2270_v33 = vld [vmem:[%s2057_s16 + $0x28] sm:$0xff]  ;;  %v590_v44 = vld [vmem:[%s2067_s14 + $0x10] sm:$0xff]  ;;  %v591_v48 = vld [vmem:[%s2067_s14 + $0x18] sm:$0xff] }
  0xbe   : > { %v2174_v60 = vmul.f32 %v475_v35, %v2139_v45  ;;  %v2177_v61 = vmul.f32 %v476_v36, %v2141_v46  ;;  %v2181_v9 = vmul.f32 %v477_v42, %v2143_v47  ;;  %v2184_v10 = vmul.f32 %v478_v43, %v2158_v52  ;;  %v589_v35 = vld [vmem:[%s2067_s14 + $0x8] sm:$0xff] }
  0xbf   : > { %v539_v62 = vadd.f32 %v1312_v49, %v538_v54  ;;  %v479_v63 = vmul.f32 %v470_v56, %v2131_v38  ;;  %v2189_v11 = vsel %vm496_vm8, 1.0, %v2667_v23  ;;  %v482_v12 = vmul.f32 %v473_v32, %v2166_v55  ;;  %v592_v54 = vld [vmem:[%s2067_s14 + $0x20] sm:$0xff] }
  0xc0   : > { %v517_v13 = vmul.f32 %v1309_v25, %v480_v57  ;;  %v518_v14 = vmul.f32 %v1310_v28, %v481_v58  ;;  %v2198_v18 = vsel %vm489_vm1, -1.0, %v480_v57  ;;  %v2202_v19 = vsel %vm490_vm2, -1.0, %v481_v58  ;;  %v2256_v25 = vld [vmem:[%s2057_s16 + $0x10] sm:$0xff]  ;;  %v588_v28 = vld [vmem:[%s2067_s14] sm:$0xff] }
  0xc1   : > { %v540_v15 = vadd.f32 %v1313_v50, %v539_v62  ;;  %v516_v16 = vmul.f32 %v1308_v24, %v479_v63  ;;  %v2194_v17 = vsel %vm488_vm0, -1.0, %v479_v63  ;;  %v2206_v20 = vsel %vm491_vm3, -1.0, %v482_v12  ;;  %571 = vst [vmem:[#allocation8 + $0x8] sm:$0xff] %v2198_v18  ;;  %572 = vst [vmem:[#allocation8 + $0x10] sm:$0xff] %v2202_v19 }
  0xc2   : > { %v2211_v0 = vsel %vm492_vm4, -1.0, %v2171_v59  ;;  %v2216_v1 = vsel %vm493_vm5, -1.0, %v2174_v60  ;;  %570 = vst [vmem:[#allocation8] sm:$0xff] %v2194_v17  ;;  %v2224_v3 = vsel %vm494_vm6, -1.0, %v2177_v61  ;;  %v2229_v4 = vsel %vm495_vm7, -1.0, %v2181_v9  ;;  %573 = vst [vmem:[#allocation8 + $0x18] sm:$0xff] %v2206_v20 }
  0xc3   : > { %v541_v2 = vadd.f32 %v2156_v51, %v540_v15  ;;  %v2234_v5 = vsel %vm496_vm8, -1.0, %v2184_v10  ;;  %574 = vst [vmem:[#allocation8 + $0x20] sm:$0xff] %v2211_v0  ;;  %575 = vst [vmem:[#allocation8 + $0x28] sm:$0xff] %v2216_v1  ;;  %v547_v8 = vadd.f32 %v480_v57, %v479_v63  ;;  %v782_v21 = vmax.f32 %v2194_v17, %v2211_v0  ;;  %v2284_v63 = vld [vmem:[%s2057_s16 + $0x38] sm:$0xff]  ;;  %v594_v15 = vld [vmem:[%s2067_s14 + $0x30] sm:$0xff] }
  0xc4   : > { %576 = vst [vmem:[#allocation8 + $0x30] sm:$0xff] %v2224_v3  ;;  %577 = vst [vmem:[#allocation8 + $0x38] sm:$0xff] %v2229_v4  ;;  %v783_v22 = vmax.f32 %v2198_v18, %v2216_v1  ;;  %v784_v24 = vmax.f32 %v2202_v19, %v2224_v3  ;;  %v519_v30 = vmul.f32 %v2128_v37, %v482_v12  ;;  %vm624_vm9 = vcmp.ge.f32.partialorder %v2241_v6, 0.1 }
  0xc5   : > { %578 = vst [vmem:[#allocation8 + $0x40] sm:$0xff] %v2234_v5  ;;  %v542_v29 = vadd.f32 %v2163_v53, %v541_v2  ;;  %v785_v31 = vmax.f32 %v2206_v20, %v2229_v4  ;;  %v525_v32 = vadd.f32 %v517_v13, %v516_v16  ;;  %v520_v36 = vmul.f32 %v1312_v49, %v2171_v59  ;;  %v593_v13 = vld [vmem:[%s2067_s14 + $0x28] sm:$0xff]  ;;  %v2292_v2 = vld [vmem:[%s2057_s16 + $0x40] sm:$0xff] }
  0xc6   : > { %v521_v42 = vmul.f32 %v1313_v50, %v2174_v60  ;;  %v548_v43 = vadd.f32 %v547_v8, %v481_v58  ;;  %v786_v37 = vmax.f32 %v782_v21, %v2234_v5  ;;  %v597_v49 = vsub.f32 %v588_v28, %v2241_v6  ;;  %v595_v8 = vld [vmem:[%s2067_s14 + $0x38] sm:$0xff]  ;;  %v596_v21 = vld [vmem:[%s2067_s14 + $0x40] sm:$0xff] }
  0xc7   : > { %v543_v56 = vadd.f32 %v2189_v11, %v542_v29  ;;  %v788_v57 = vmax.f32 %v784_v24, %v785_v31  ;;  %v526_v62 = vadd.f32 %v525_v32, %v518_v14  ;;  %v522_v50 = vmul.f32 %v2156_v51, %v2177_v61 }
  0xc8   : > { %v549_v58 = vadd.f32 %v548_v43, %v482_v12  ;;  %v787_v16 = vmax.f32 %v786_v37, %v783_v22  ;;  %v598_v23 = vsub.f32 %v589_v35, %v2244_v7  ;;  %v599_v14 = vsub.f32 %v590_v44, %v2256_v25 }
  0xc9   : > { %726 = vadd.xlane.f32.xlu0 %v543_v56  ;;  %v527_v24 = vadd.f32 %v526_v62, %v519_v30  ;;  %v600_v29 = vsub.f32 %v591_v48, %v2259_v26  ;;  %v601_v31 = vsub.f32 %v592_v54, %v2262_v27  ;;  %v602_v51 = vsub.f32 %v593_v13, %v2270_v33 }
  0xca   : > { %v550_v28 = vadd.f32 %v549_v58, %v2171_v59  ;;  %v789_v32 = vmax.f32 %v787_v16, %v788_v57  ;;  %v603_v12 = vsub.f32 %v594_v15, %v2273_v34  ;;  %v604_v43 = vsub.f32 %v595_v8, %v2284_v63 }
  0xcb   : > { %v528_v22 = vadd.f32 %v527_v24, %v520_v36  ;;  %v605_v35 = vsub.f32 %v596_v21, %v2292_v2  ;;  %v606_v37 = vmul.f32 %v597_v49, %v597_v49  ;;  %v523_v30 = vmul.f32 %v2163_v53, %v2181_v9 }
  0xcc   : > { %v551_v44 = vadd.f32 %v550_v28, %v2174_v60  ;;  %v607_v48 = vmul.f32 %v598_v23, %v598_v23  ;;  %v524_v59 = vmul.f32 %v2189_v11, %v2184_v10  ;;  %v608_v56 = vmul.f32 %v599_v14, %v599_v14 }
  0xcd   : > { %790 = vmax.xlane.f32.xlu0 %v789_v32  ;;  %v529_v54 = vadd.f32 %v528_v22, %v521_v42  ;;  %v609_v57 = vmul.f32 %v600_v29, %v600_v29  ;;  %v610_v62 = vmul.f32 %v601_v31, %v601_v31  ;;  %v611_v13 = vmul.f32 %v602_v51, %v602_v51 }
  0xce   : > { %v552_v36 = vadd.f32 %v551_v44, %v2177_v61  ;;  %v612_v15 = vmul.f32 %v603_v12, %v603_v12  ;;  %v613_v49 = vmul.f32 %v604_v43, %v604_v43  ;;  %v614_v16 = vmul.f32 %v605_v35, %v605_v35 }
  0xcf   : > { %v530_v58 = vadd.f32 %v529_v54, %v522_v50  ;;  %v615_v53 = vmul.f32 %v606_v37, %v2131_v38  ;;  %v616_v23 = vmul.f32 %v607_v48, %v2133_v39  ;;  %vm625_vm10 = vcmp.ge.f32.partialorder %v2244_v7, 0.1 }
  0xd0   : > { %v553_v60 = vadd.f32 %v552_v36, %v2181_v9  ;;  %vm626_vm11 = vcmp.ge.f32.partialorder %v2256_v25, 0.1  ;;  %vm627_vm12 = vcmp.ge.f32.partialorder %v2259_v26, 0.1  ;;  %vm628_vm13 = vcmp.ge.f32.partialorder %v2262_v27, 0.1 }
  0xd1   : > { %v531_v11 = vadd.f32 %v530_v58, %v523_v30  ;;  %v617_v42 = vmul.f32 %v608_v56, %v2135_v40  ;;  %v618_v38 = vmul.f32 %v609_v57, %v2166_v55  ;;  %v619_v9 = vmul.f32 %v610_v62, %v2137_v41 }
  0xd2   : > { %v554_v61 = vadd.f32 %v553_v60, %v2184_v10  ;;  %v620_v39 = vmul.f32 %v611_v13, %v2139_v45  ;;  %vm629_vm14 = vcmp.ge.f32.partialorder %v2270_v33, 0.1  ;;  %v2696_v50 = vmov 0.0  }
  0xd3   : > { %v1317_v8 = vsel %vm624_vm9, 1.0, %v2696_v50  ;;  %v1318_v21 = vsel %vm625_vm10, 1.0, %v2696_v50  ;;  %v532_v10 = vadd.f32 %v531_v11, %v524_v59  ;;  %v1319_v40 = vsel %vm626_vm11, 1.0, %v2696_v50 }
  0xd4   : > { %735 = vadd.xlane.f32.xlu1 %v554_v61  ;;  %v1320_v41 = vsel %vm627_vm12, 1.0, %v2696_v50  ;;  %v1321_v45 = vsel %vm628_vm13, 1.0, %v2696_v50  ;;  %v621_v55 = vmul.f32 %v612_v15, %v2141_v46  ;;  %v622_v24 = vmul.f32 %v613_v49, %v2143_v47 }
  0xd5   : > { %v623_v14 = vmul.f32 %v614_v16, %v2158_v52  ;;  %v652_v29 = vmul.f32 %v1317_v8, %v615_v53  ;;  %vm630_vm15 = vcmp.ge.f32.partialorder %v2273_v34, 0.1  ;;  %vm631_vm0 = vcmp.ge.f32.partialorder %v2284_v63, 0.1 }
  0xd6   : > { %v653_v31 = vmul.f32 %v1318_v21, %v616_v23  ;;  %v654_v28 = vmul.f32 %v1319_v40, %v617_v42  ;;  %vm632_vm1 = vcmp.ge.f32.partialorder %v2292_v2, 0.1  ;;  %v1322_v32 = vsel %vm629_vm14, 1.0, %v2696_v50 }
  0xd7   : > { %v655_v51 = vmul.f32 %v1320_v41, %v618_v38  ;;  %v656_v12 = vmul.f32 %v1321_v45, %v619_v9  ;;  %v693_v47 = vsel %vm624_vm9, -1.0, %v615_v53  ;;  %v694_v52 = vsel %vm625_vm10, -1.0, %v616_v23 }
  0xd8   : > { %717 = vadd.xlane.f32.xlu1 %v532_v10  ;;  %v661_v46 = vadd.f32 %v653_v31, %v652_v29  ;;  %v695_v22 = vsel %vm626_vm11, -1.0, %v617_v42  ;;  %v696_v43 = vsel %vm627_vm12, -1.0, %v618_v38  ;;  %v697_v35 = vsel %vm628_vm13, -1.0, %v619_v9  ;;  %704 = vst [vmem:[#allocation9] sm:$0xff] %v693_v47  ;;  %705 = vst [vmem:[#allocation9 + $0x8] sm:$0xff] %v694_v52 }
  0xd9   : > { %v698_v37 = vsel %vm629_vm14, -1.0, %v620_v39  ;;  %v699_v30 = vsel %vm630_vm15, -1.0, %v621_v55  ;;  %706 = vst [vmem:[#allocation9 + $0x10] sm:$0xff] %v695_v22  ;;  %v700_v7 = vsel %vm631_vm0, -1.0, %v622_v24  ;;  %v701_v25 = vsel %vm632_vm1, -1.0, %v623_v14  ;;  %707 = vst [vmem:[#allocation9 + $0x18] sm:$0xff] %v696_v43 }
  0xda   : > { %v662_v6 = vadd.f32 %v661_v46, %v654_v28  ;;  %708 = vst [vmem:[#allocation9 + $0x20] sm:$0xff] %v697_v35  ;;  %709 = vst [vmem:[#allocation9 + $0x28] sm:$0xff] %v698_v37  ;;  %v672_v26 = vadd.f32 %v1318_v21, %v1317_v8  ;;  %v1323_v27 = vsel %vm630_vm15, 1.0, %v2696_v50  ;;  %v683_v33 = vadd.f32 %v616_v23, %v615_v53 }
  0xdb   : > { %710 = vst [vmem:[#allocation9 + $0x30] sm:$0xff] %v699_v30  ;;  %711 = vst [vmem:[#allocation9 + $0x38] sm:$0xff] %v700_v7  ;;  %v657_v44 = vmul.f32 %v1322_v32, %v620_v39  ;;  %v1324_v54 = vsel %vm631_vm0, 1.0, %v2696_v50  ;;  %v658_v57 = vmul.f32 %v1323_v27, %v621_v55  ;;  %v1325_v13 = vsel %vm632_vm1, 1.0, %v2696_v50 }
  0xdc   : > { %712 = vst [vmem:[#allocation9 + $0x40] sm:$0xff] %v701_v25  ;;  %v663_v48 = vadd.f32 %v662_v6, %v655_v51  ;;  %v673_v59 = vadd.f32 %v1319_v40, %v672_v26  ;;  %v684_v56 = vadd.f32 %v683_v33, %v617_v42  ;;  %v659_v15 = vmul.f32 %v1324_v54, %v622_v24 }
  0xdd   : > { %v660_v53 = vmul.f32 %v1325_v13, %v623_v14 }
  0xde   : > { %v664_v36 = vadd.f32 %v663_v48, %v656_v12  ;;  %v674_v62 = vadd.f32 %v1320_v41, %v673_v59  ;;  %v685_v34 = vadd.f32 %v684_v56, %v618_v38 }
  0xe0   : > { %v665_v58 = vadd.f32 %v664_v36, %v657_v44  ;;  %v675_v49 = vadd.f32 %v1321_v45, %v674_v62  ;;  %v686_v16 = vadd.f32 %v685_v34, %v619_v9 }
  0xe2   : > { %v666_v60 = vadd.f32 %v665_v58, %v658_v57  ;;  %v676_v23 = vadd.f32 %v1322_v32, %v675_v49  ;;  %v687_v11 = vadd.f32 %v686_v16, %v620_v39 }
  0xe4   : > { %v667_v61 = vadd.f32 %v666_v60, %v659_v15  ;;  %v677_v63 = vadd.f32 %v1323_v27, %v676_v23  ;;  %v688_v8 = vadd.f32 %v687_v11, %v621_v55 }
  0xe6   : > { %v668_v42 = vadd.f32 %v667_v61, %v660_v53  ;;  %v678_v21 = vadd.f32 %v1324_v54, %v677_v63  ;;  %v689_v10 = vadd.f32 %v688_v8, %v622_v24 }
  0xe8   : > { %744 = vadd.xlane.f32.xlu0 %v668_v42  ;;  %v679_v40 = vadd.f32 %v1325_v13, %v678_v21  ;;  %v690_v41 = vadd.f32 %v689_v10, %v623_v14 }
  0xea   : > { %753 = vadd.xlane.f32.xlu1 %v679_v40 }
  0xec   : > { %762 = vadd.xlane.f32.xlu0 %v690_v41  ;;  %v2395_v41 = vmov 0.0  }
 0x156   : > { %v727_v2 = vpop.xlane.xlu0 %726 }
 0x157   : > { %v728_v38 = vrot.slane %v727_v2, 4 }
 0x159   : > { %v729_v50 = vadd.f32 %v728_v38, %v727_v2 }
 0x15a   : > { %v791_v45 = vpop.xlane.xlu0 %790 }
 0x15b   : > { %v730_v9 = vrot.slane %v729_v50, 2  ;;  %v792_v29 = vrot.slane %v791_v45, 4 }
 0x15d   : > { %v731_v31 = vadd.f32 %v730_v9, %v729_v50  ;;  %v793_v28 = vmax.f32 %v791_v45, %v792_v29 }
 0x15f   : > { %v732_v39 = vrot.slane %v731_v31, 1  ;;  %v794_v32 = vrot.slane %v793_v28, 2 }
 0x161   : > { %v2376_v51 = vadd.f32 %v732_v39, %v731_v31  ;;  %v736_v55 = vpop.xlane.xlu1 %735  ;;  %v795_v12 = vmax.f32 %v793_v28, %v794_v32 }
 0x162   : > { %v737_v24 = vrot.slane %v736_v55, 4 }
 0x163   : > { %vm770_vm2 = vcmp.gt.f32.partialorder %v2376_v51, 0.0  ;;  %v771_v14 = vmul.f32 3.0, %v2376_v51  ;;  %v796_v46 = vrot.slane %v795_v12, 1 }
 0x164   : > { %v738_v47 = vadd.f32 %v737_v24, %v736_v55 }
 0x165   : > { %v2380_v52 = vsel %vm770_vm2, %v771_v14, 500.0  ;;  %v797_v22 = vmax.f32 %v795_v12, %v796_v46  ;;  %v718_v43 = vpop.xlane.xlu1 %717 }
 0x166   : > { %v739_v35 = vrot.slane %v738_v47, 2  ;;  %v719_v37 = vrot.slane %v718_v43, 4 }
 0x167   : > { %v798_v30 = vmax.f32 %v797_v22, 0.0 }
 0x168   : > { %v740_v6 = vadd.f32 %v739_v35, %v738_v47  ;;  %v720_v7 = vadd.f32 %v719_v37, %v718_v43 }
 0x169   : > { %v799_v25 = vmul.f32 1.0039063, %v798_v30 }
 0x16a   : > { %v741_v26 = vrot.slane %v740_v6, 1  ;;  %v721_v27 = vrot.slane %v720_v7, 2 }
 0x16b   : > { %v800_v33 = vadd.f32 1e-30, %v799_v25  }
 0x16c   : > { %v2382_v44 = vadd.f32 %v741_v26, %v740_v6  ;;  %v722_v48 = vadd.f32 %v721_v27, %v720_v7 }
 0x16e   : > { %v723_v59 = vrot.slane %v722_v48, 1 }
 0x170   : > { %v2384_v54 = vadd.f32 %v723_v59, %v722_v48 }
 0x175   : > { %v745_v56 = vpop.xlane.xlu0 %744 }
 0x176   : > { %v746_v57 = vrot.slane %v745_v56, 4 }
 0x177   : > { %v754_v36 = vpop.xlane.xlu1 %753 }
 0x178   : > { %v747_v62 = vadd.f32 %v746_v57, %v745_v56  ;;  %v755_v13 = vrot.slane %v754_v36, 4 }
 0x179   : > { %v763_v34 = vpop.xlane.xlu0 %762 }
 0x17a   : > { %v748_v15 = vrot.slane %v747_v62, 2  ;;  %v756_v58 = vadd.f32 %v755_v13, %v754_v36  ;;  %v764_v49 = vrot.slane %v763_v34, 4 }
 0x17c   : > { %v749_v16 = vadd.f32 %v748_v15, %v747_v62  ;;  %v757_v53 = vrot.slane %v756_v58, 2  ;;  %v765_v60 = vadd.f32 %v764_v49, %v763_v34 }
 0x17e   : > { %v750_v23 = vrot.slane %v749_v16, 1  ;;  %v758_v11 = vadd.f32 %v757_v53, %v756_v58  ;;  %v766_v61 = vrot.slane %v765_v60, 2 }
 0x180   : > { %v2386_v63 = vadd.f32 %v750_v23, %v749_v16  ;;  %v759_v8 = vrot.slane %v758_v11, 1  ;;  %v767_v42 = vadd.f32 %v766_v61, %v765_v60 }
 0x182   : > { %v2388_v21 = vadd.f32 %v759_v8, %v758_v11  ;;  %v768_v10 = vrot.slane %v767_v42, 1 }
 0x184   : > { %v2390_v40 = vadd.f32 %v768_v10, %v767_v42 }
 0x185 LB: >> { %v809_v2 = vadd.f32 %v1741_v33, %v1745_v41  ;;  %v811_v38 = vld [vmem:[#allocation8] sm:$0xff]  ;;  %v812_v50 = vld [vmem:[#allocation8 + $0x8] sm:$0xff]  ;;  %v813_v45 = vld [vmem:[#allocation8 + $0x10] sm:$0xff]  ;;  %v1769_v28 = vmov 0.0   ;;  %s806_s17 = sadd.s32 1, %s1749_s17   ;;  %s1749_s17 = sphi %s2397_s17, %s806_s17   ;;  %v1745_v41 = vphi %v2395_v41, %v2700_v41   ;;  %v1741_v33 = vphi %v800_v33, %v2699_v33  }
 0x186   : >> { %v814_v29 = vld [vmem:[#allocation8 + $0x18] sm:$0xff]  ;;  %v815_v31 = vld [vmem:[#allocation8 + $0x20] sm:$0xff]  ;;  %v816_v55 = vld [vmem:[#allocation8 + $0x28] sm:$0xff]  ;;  %p803_p12 = scmp.ge.s32.totalorder %s806_s17, 32  }
 0x187   : >> { %v810_v9 = vmul.f32 0.5, %v809_v2  ;;  %v817_v14 = vld [vmem:[#allocation8 + $0x30] sm:$0xff]  ;;  %v818_v22 = vld [vmem:[#allocation8 + $0x38] sm:$0xff]  ;;  %v819_v37 = vld [vmem:[#allocation8 + $0x40] sm:$0xff]  ;;  %v2701_v53 = vmov (%p803_p12), 0.0   ;;  %s2527_s26 = smov (%p803_p12), 0  }
 0x188   : > { %v2437_v10 = vld [vmem:[#allocation9] sm:$0xff] (%p803_p12) }
 0x189   : >> { %vm820_vm3 = vcmp.ge.f32.partialorder %v811_v38, %v810_v9  ;;  %vm821_vm4 = vcmp.ge.f32.partialorder %v812_v50, %v810_v9  ;;  %vm822_vm5 = vcmp.ge.f32.partialorder %v813_v45, %v810_v9  ;;  %vm823_vm6 = vcmp.ge.f32.partialorder %v814_v29, %v810_v9  ;;  %v2448_v45 = vld [vmem:[#allocation9 + $0x8] sm:$0xff] (%p803_p12)  ;;  %v2456_v29 = vld [vmem:[#allocation9 + $0x10] sm:$0xff] (%p803_p12) }
 0x18a   : >> { %v829_v39 = vsel %vm820_vm3, 1.0, %v1769_v28  ;;  %v830_v32 = vsel %vm821_vm4, 1.0, %v1769_v28  ;;  %v831_v12 = vsel %vm822_vm5, 1.0, %v1769_v28  ;;  %vm824_vm7 = vcmp.ge.f32.partialorder %v815_v31, %v810_v9  ;;  %v2460_v31 = vld [vmem:[#allocation9 + $0x28] sm:$0xff] (%p803_p12) }
 0x18b   : >> { %v838_v24 = vadd.f32 %v830_v32, %v829_v39  ;;  %v832_v46 = vsel %vm823_vm6, 1.0, %v1769_v28  ;;  %vm825_vm8 = vcmp.ge.f32.partialorder %v816_v55, %v810_v9  ;;  %v833_v43 = vsel %vm824_vm7, 1.0, %v1769_v28  ;;  %v2468_v55 = vld [vmem:[#allocation9 + $0x30] sm:$0xff] (%p803_p12) }
 0x18c   : >> { %vm826_vm9 = vcmp.ge.f32.partialorder %v817_v14, %v810_v9  ;;  %v834_v30 = vsel %vm825_vm8, 1.0, %v1769_v28  ;;  %vm827_vm10 = vcmp.ge.f32.partialorder %v818_v22, %v810_v9  ;;  %vm828_vm11 = vcmp.ge.f32.partialorder %v819_v37, %v810_v9 }
 0x18d   : >> { %v839_v47 = vadd.f32 %v838_v24, %v831_v12  ;;  %v835_v7 = vsel %vm826_vm9, 1.0, %v1769_v28  ;;  %v836_v26 = vsel %vm827_vm10, 1.0, %v1769_v28  ;;  %v837_v48 = vsel %vm828_vm11, 1.0, %v1769_v28  ;;  %v2470_v12 = vld [vmem:[#allocation9 + $0x38] sm:$0xff] (%p803_p12) }
 0x18e   : > { %v933_v37 = vmax.f32 (%p803_p12), %v2456_v29, %v2468_v55  ;;  %vm919_vm6 = vcmp.gt.f32.partialorder (%p803_p12), %v2388_v21, 0.0 }
 0x18f   : >> { %v840_v35 = vadd.f32 %v839_v47, %v832_v46 }
 0x191   : >> { %v841_v6 = vadd.f32 %v840_v35, %v833_v43  ;;  %v932_v43 = vmax.f32 (%p803_p12), %v2448_v45, %v2460_v31 }
 0x193   : >> { %v842_v25 = vadd.f32 %v841_v6, %v834_v30 }
 0x195   : >> { %v843_v27 = vadd.f32 %v842_v25, %v835_v7 }
 0x197   : >> { %v844_v59 = vadd.f32 %v843_v27, %v836_v26 }
 0x199   : >> { %v845_v56 = vadd.f32 %v844_v59, %v837_v48 }
 0x19b   : >> { %846 = vadd.xlane.f32.xlu0 %v845_v56 }
 0x228   : >> { %v847_v57 = vpop.xlane.xlu0 %846 }
 0x229   : >> { %v848_v36 = vrot.slane %v847_v57, 4 }
 0x22b   : >> { %v849_v62 = vadd.f32 %v848_v36, %v847_v57 }
 0x22d   : >> { %v850_v13 = vrot.slane %v849_v62, 2 }
 0x22f   : >> { %v851_v34 = vadd.f32 %v850_v13, %v849_v62 }
 0x231   : >> { %v852_v15 = vrot.slane %v851_v34, 1 }
 0x232   : > { %805 = sbr.rel (!%p803_p12) target bundleno = 389 (0x185), region = 157 }
 0x233   : >> { %v853_v58 = vadd.f32 %v852_v15, %v851_v34 }
 0x235   : >> { %vm854_vm12 = vcmp.ge.f32.partialorder %v853_v58, %v2380_v52  ;;  %v920_v58 = vmul.f32 (%p803_p12), 3.0, %v2388_v21 }
 0x236   : >> { %v2405_v41 = vsel %vm854_vm12, %v810_v9, %v1745_v41   ;;  %v2407_v33 = vsel %vm854_vm12, %v1741_v33, %v810_v9  }
 0x237   : >> { %v2697_v49 = vmov %v2405_v41  ;;  %v2698_v16 = vmov %v2407_v33 }
 0x238   : >> { %v2699_v33 = vmov %v2698_v16  ;;  %v2700_v41 = vmov %v2697_v49  ;;  %vm857_vm13 = vcmp.ge.f32.partialorder (%p803_p12), %v2194_v17, %v2698_v16  ;;  %vm858_vm14 = vcmp.ge.f32.partialorder (%p803_p12), %v2198_v18, %v2698_v16 }
 0x239   : > { %vm859_vm15 = vcmp.ge.f32.partialorder %v2202_v19, %v2698_v16  ;;  %vm860_vm0 = vcmp.ge.f32.partialorder %v2206_v20, %v2698_v16  ;;  %v891_v60 = vsel %vm857_vm13, 1.0, %v2701_v53  ;;  %v892_v23 = vsel %vm858_vm14, 1.0, %v2701_v53  ;;  %v2439_v41 = vld [vmem:[#allocation9 + $0x20] sm:$0xff] }
 0x23a   : > { %v893_v11 = vsel %vm859_vm15, 1.0, %v2701_v53  ;;  %vm861_vm1 = vcmp.ge.f32.partialorder %v2211_v0, %v2698_v16  ;;  %v900_v33 = vadd.f32 %v892_v23, %v891_v60  ;;  %v866_v61 = vsel %vm857_vm13, %v2194_v17, 0.0 }
 0x23b   : > { %v894_v8 = vsel %vm860_vm0, 1.0, %v2701_v53  ;;  %v867_v42 = vsel %vm858_vm14, %v2198_v18, 0.0  ;;  %vm862_vm2 = vcmp.ge.f32.partialorder %v2216_v1, %v2698_v16  ;;  %v868_v38 = vsel %vm859_vm15, %v2202_v19, 0.0  ;;  %v2458_v19 = vld [vmem:[#allocation9 + $0x18] sm:$0xff] }
 0x23c   : > { %v901_v2 = vadd.f32 %v900_v33, %v893_v11  ;;  %v895_v17 = vsel %vm861_vm1, 1.0, %v2701_v53  ;;  %v875_v50 = vadd.f32 %v867_v42, %v866_v61  ;;  %vm863_vm3 = vcmp.ge.f32.partialorder %v2224_v3, %v2698_v16 }
 0x23d   : > { %v869_v9 = vsel %vm860_vm0, %v2206_v20, 0.0  ;;  %v931_v28 = vmax.f32 %v2437_v10, %v2439_v41  ;;  %v896_v39 = vsel %vm862_vm2, 1.0, %v2701_v53  ;;  %v2472_v20 = vld [vmem:[#allocation9 + $0x40] sm:$0xff]  ;;  %vm864_vm4 = vcmp.ge.f32.partialorder %v2229_v4, %v2698_v16 }
 0x23e   : > { %v902_v18 = vadd.f32 %v901_v2, %v894_v8  ;;  %v876_v32 = vadd.f32 %v875_v50, %v868_v38  ;;  %vm865_vm5 = vcmp.ge.f32.partialorder %v2234_v5, %v2698_v16  ;;  %v870_v14 = vsel %vm861_vm1, %v2211_v0, 0.0 }
 0x23f   : > { %v897_v46 = vsel %vm863_vm3, 1.0, %v2701_v53  ;;  %v871_v47 = vsel %vm862_vm2, %v2216_v1, 0.0  ;;  %v934_v0 = vmax.f32 %v2458_v19, %v2470_v12  ;;  %v935_v30 = vmax.f32 %v931_v28, %v2472_v20 }
 0x240   : > { %v903_v24 = vadd.f32 %v902_v18, %v895_v17  ;;  %v877_v22 = vadd.f32 %v876_v32, %v869_v9  ;;  %v898_v6 = vsel %vm864_vm4, 1.0, %v2701_v53  ;;  %v872_v25 = vsel %vm863_vm3, %v2224_v3, 0.0 }
 0x241   : > { %v899_v26 = vsel %vm865_vm5, 1.0, %v2701_v53  ;;  %v873_v59 = vsel %vm864_vm4, %v2229_v4, 0.0  ;;  %v936_v56 = vmax.f32 %v935_v30, %v932_v43  ;;  %v937_v57 = vmax.f32 %v933_v37, %v934_v0 }
 0x242   : > { %v904_v35 = vadd.f32 %v903_v24, %v896_v39  ;;  %v878_v7 = vadd.f32 %v877_v22, %v870_v14  ;;  %v874_v3 = vsel %vm865_vm5, %v2234_v5, 0.0  ;;  %v2519_v4 = vsel %vm919_vm6, %v920_v58, 500.0 }
 0x243   : > { %v938_v34 = vmax.f32 %v936_v56, %v937_v57  ;;  %v1755_v0 = vmov 0.0  }
 0x244   : > { %v905_v1 = vadd.f32 %v904_v35, %v897_v46  ;;  %v879_v27 = vadd.f32 %v878_v7, %v871_v47 }
 0x246   : > { %v906_v48 = vadd.f32 %v905_v1, %v898_v6  ;;  %v880_v36 = vadd.f32 %v879_v27, %v872_v25 }
 0x248   : > { %v907_v62 = vadd.f32 %v906_v48, %v899_v26  ;;  %v881_v13 = vadd.f32 %v880_v36, %v873_v59 }
 0x24a   : > { %908 = vadd.xlane.f32.xlu0 %v907_v62  ;;  %v882_v15 = vadd.f32 %v881_v13, %v874_v3 }
 0x24c   : > { %883 = vadd.xlane.f32.xlu1 %v882_v15 }
 0x24e   : > { %939 = vmax.xlane.f32.xlu0 %v938_v34 }
 0x2d7   : > { %v909_v53 = vpop.xlane.xlu0 %908 }
 0x2d8   : > { %v910_v60 = vrot.slane %v909_v53, 4 }
 0x2d9   : > { %v884_v11 = vpop.xlane.xlu1 %883 }
 0x2da   : > { %v911_v23 = vadd.f32 %v910_v60, %v909_v53  ;;  %v885_v33 = vrot.slane %v884_v11, 4 }
 0x2db   : > { %v940_v61 = vpop.xlane.xlu0 %939 }
 0x2dc   : > { %v912_v16 = vrot.slane %v911_v23, 2  ;;  %v941_v5 = vrot.slane %v940_v61, 4  ;;  %v886_v8 = vadd.f32 %v885_v33, %v884_v11 }
 0x2de   : > { %v913_v42 = vadd.f32 %v912_v16, %v911_v23  ;;  %v942_v2 = vmax.f32 %v940_v61, %v941_v5  ;;  %v887_v38 = vrot.slane %v886_v8, 2 }
 0x2e0   : > { %v914_v17 = vrot.slane %v913_v42, 1  ;;  %v943_v50 = vrot.slane %v942_v2, 2  ;;  %v888_v18 = vadd.f32 %v887_v38, %v886_v8 }
 0x2e2   : > { %v915_v9 = vadd.f32 %v914_v17, %v913_v42  ;;  %v944_v28 = vmax.f32 %v942_v2, %v943_v50  ;;  %v889_v39 = vrot.slane %v888_v18, 1 }
 0x2e4   : > { %v916_v32 = vsub.f32 %v2380_v52, %v915_v9  ;;  %v945_v24 = vrot.slane %v944_v28, 1  ;;  %v890_v46 = vadd.f32 %v889_v39, %v888_v18 }
 0x2e6   : > { %v917_v14 = vmul.f32 %v916_v32, %v2697_v49  ;;  %v946_v47 = vmax.f32 %v944_v28, %v945_v24 }
 0x2e8   : > { %v2523_v22 = vadd.f32 %v917_v14, %v890_v46  ;;  %v947_v43 = vmax.f32 %v946_v47, 0.0 }
 0x2ea   : > { %v948_v35 = vmul.f32 1.0039063, %v947_v43 }
 0x2ec   : > { %v949_v37 = vadd.f32 1e-30, %v948_v35  }
 0x2ed LB: >> { %v958_v52 = vadd.f32 %v1753_v37, %v1757_v0  ;;  %v960_v49 = vld [vmem:[#allocation9] sm:$0xff]  ;;  %v961_v30 = vld [vmem:[#allocation9 + $0x8] sm:$0xff]  ;;  %v962_v6 = vld [vmem:[#allocation9 + $0x10] sm:$0xff]  ;;  %v1770_v26 = vmov 0.0   ;;  %s955_s26 = sadd.s32 1, %s1761_s26   ;;  %s1761_s26 = sphi %s2527_s26, %s955_s26   ;;  %v1757_v0 = vphi %v1755_v0, %v1756_v0   ;;  %v1753_v37 = vphi %v949_v37, %v2703_v37  }
 0x2ee   : >> { %v963_v1 = vld [vmem:[#allocation9 + $0x18] sm:$0xff]  ;;  %v964_v25 = vld [vmem:[#allocation9 + $0x20] sm:$0xff]  ;;  %v965_v59 = vld [vmem:[#allocation9 + $0x28] sm:$0xff]  ;;  %p952_p6 = scmp.ge.s32.totalorder %s955_s26, 32  }
 0x2ef   : >> { %v959_v7 = vmul.f32 0.5, %v958_v52  ;;  %v966_v36 = vld [vmem:[#allocation9 + $0x30] sm:$0xff]  ;;  %v967_v13 = vld [vmem:[#allocation9 + $0x38] sm:$0xff]  ;;  %v968_v58 = vld [vmem:[#allocation9 + $0x40] sm:$0xff]  ;;  %v2704_v32 = vmov (%p952_p6), 0.0   ;;  %s1326_s27 = sshll.u32 (%p952_p6), %s1729_s21, 4 }
 0x2f0   : > { %s1097_s1 = sshll.u32 (%p952_p6), %s417_s30, 4  ;;  %s2600_s12 = scalar_lea.hbm (%p952_p6), %s2656_s5, %s1326_s27  ;;  %s2602_s1 = int_to_ptr.vmem [resolvable:$true] %s1097_s1 }
 0x2f1   : >> { %vm969_vm7 = vcmp.ge.f32.partialorder %v960_v49, %v959_v7  ;;  %vm970_vm8 = vcmp.ge.f32.partialorder %v961_v30, %v959_v7  ;;  %vm971_vm9 = vcmp.ge.f32.partialorder %v962_v6, %v959_v7  ;;  %vm972_vm10 = vcmp.ge.f32.partialorder %v963_v1, %v959_v7  ;;  %s1085_s21 = scalar_lea.sflag (%p952_p6), [#allocation12], %s2044_s29  ;;  %s1623_s15 = scalar_lea.vmem (%p952_p6), %s2602_s1, 16 }
 0x2f2   : >> { %v978_v27 = vsel %vm969_vm7, 1.0, %v1770_v26  ;;  %v979_v48 = vsel %vm970_vm8, 1.0, %v1770_v26  ;;  %v980_v56 = vsel %vm971_vm9, 1.0, %v1770_v26  ;;  %vm973_vm11 = vcmp.ge.f32.partialorder %v964_v25, %v959_v7  ;;  %p1624_p0 = scmp.ne.s32.totalorder (%p952_p6), %s2602_s1, %s1623_s15  ;;  %p2705_p2 = scmp.ne.s32.totalorder (%p952_p6), %s2678_s6, 0 }
 0x2f3   : >> { %v987_v57 = vadd.f32 %v979_v48, %v978_v27  ;;  %v981_v62 = vsel %vm972_vm10, 1.0, %v1770_v26  ;;  %vm974_vm12 = vcmp.ge.f32.partialorder %v965_v59, %v959_v7  ;;  %v982_v34 = vsel %vm973_vm11, 1.0, %v1770_v26  ;;  %s1771_s3 = smov (%p952_p6), [#allocation19]  }
 0x2f4   : >> { %vm975_vm13 = vcmp.ge.f32.partialorder %v966_v36, %v959_v7  ;;  %v983_v53 = vsel %vm974_vm12, 1.0, %v1770_v26  ;;  %vm976_vm14 = vcmp.ge.f32.partialorder %v967_v13, %v959_v7  ;;  %vm977_vm15 = vcmp.ge.f32.partialorder %v968_v58, %v959_v7  ;;  %p1625_p3 = pnand (%p952_p6), %p1624_p0, %p2705_p2  ;;  %s1627_s7 = sshll.u32 (%p952_p6), %s1771_s3, 4  ;;  %s1628_s7 = int_to_ptr.vmem [resolvable:$false] %s1627_s7 }
 0x2f5   : >> { %v988_v3 = vadd.f32 %v987_v57, %v980_v56  ;;  %v984_v23 = vsel %vm975_vm13, 1.0, %v1770_v26  ;;  %v985_v33 = vsel %vm976_vm14, 1.0, %v1770_v26  ;;  %v986_v16 = vsel %vm977_vm15, 1.0, %v1770_v26  ;;  %s1629_s23 = scalar_lea.vmem (%p952_p6), %s1628_s7, 32  ;;  %p1630_p11 = scmp.lt.s32.totalorder (%p952_p6), %s2602_s1, %s1628_s7 }
 0x2f6   : > { %vm1068_vm10 = vcmask (%p952_p6), 7168   ;;  %vm1070_vm11 = vcmask (%p952_p6), 15360   ;;  %vm1072_vm12 = vcmask (%p952_p6), 23552   ;;  %vm1074_vm13 = vcmask (%p952_p6), 31744   ;;  %p1626_p13 = pneg (%p952_p6), %p1625_p3  ;;  %p1631_p10 = scmp.lt.s32.totalorder (%p952_p6), %s1629_s23, %s1623_s15 }
 0x2f7   : >> { %v989_v15 = vadd.f32 %v988_v3, %v981_v62  ;;  %vm1076_vm14 = vcmask (%p952_p6), 39936   ;;  %vm1078_vm15 = vcmask (%p952_p6), 48128  }
 0x2f8   : > { %p1632_p5 = por (%p952_p6), %p1631_p10, %p1630_p11 }
 0x2f9   : >> { %v990_v60 = vadd.f32 %v989_v15, %v982_v34 }
 0x2fa   : > { %p1633_p7 = pnand (%p952_p6), %p1632_p5, %p1626_p13 }
 0x2fb   : >> { %v991_v11 = vadd.f32 %v990_v60, %v983_v53 }
 0x2fd   : >> { %v992_v61 = vadd.f32 %v991_v11, %v984_v23 }
 0x2ff   : >> { %v993_v5 = vadd.f32 %v992_v61, %v985_v33 }
 0x301   : >> { %v994_v8 = vadd.f32 %v993_v5, %v986_v16 }
 0x303   : >> { %995 = vadd.xlane.f32.xlu0 %v994_v8 }
 0x390   : >> { %v996_v42 = vpop.xlane.xlu0 %995 }
 0x391   : >> { %v997_v2 = vrot.slane %v996_v42, 4 }
 0x393   : >> { %v998_v38 = vadd.f32 %v997_v2, %v996_v42 }
 0x395   : >> { %v999_v17 = vrot.slane %v998_v38, 2 }
 0x397   : >> { %v1000_v50 = vadd.f32 %v999_v17, %v998_v38 }
 0x399   : >> { %v1001_v18 = vrot.slane %v1000_v50, 1 }
 0x39a   : > { %954 = sbr.rel (!%p952_p6) target bundleno = 749 (0x2ed), region = 168 }
 0x39b   : >> { %v1002_v9 = vadd.f32 %v1001_v18, %v1000_v50 }
 0x39d   : >> { %vm1003_vm0 = vcmp.ge.f32.partialorder %v1002_v9, %v2519_v4 }
 0x39e   : >> { %v2534_v0 = vsel %vm1003_vm0, %v959_v7, %v1757_v0   ;;  %v1005_v39 = vsel %vm1003_vm0, %v1753_v37, %v959_v7   ;;  %vm1080_vm0 = vcmask (%p952_p6), 56320  }
 0x39f   : >> { %v2702_v28 = vmov %v2534_v0  ;;  %v2703_v37 = vmov %v1005_v39  ;;  %vm1006_vm1 = vcmp.ge.f32.partialorder (%p952_p6), %v2437_v10, %v1005_v39  ;;  %vm1007_vm2 = vcmp.ge.f32.partialorder (%p952_p6), %v2448_v45, %v1005_v39 }
 0x3a0   : >> { %v1756_v0 = vmov %v2702_v28   ;;  %vm1008_vm3 = vcmp.ge.f32.partialorder (%p952_p6), %v2456_v29, %v1005_v39  ;;  %vm1009_vm4 = vcmp.ge.f32.partialorder (%p952_p6), %v2458_v19, %v1005_v39  ;;  %v1040_v24 = vsel (%p952_p6), %vm1006_vm1, 1.0, %v2704_v32 }
 0x3a1   : > { %v1041_v14 = vsel %vm1007_vm2, 1.0, %v2704_v32  ;;  %v1042_v46 = vsel %vm1008_vm3, 1.0, %v2704_v32  ;;  %vm1010_vm5 = vcmp.ge.f32.partialorder %v2439_v41, %v1005_v39  ;;  %v1015_v43 = vsel %vm1006_vm1, %v2437_v10, 0.0 }
 0x3a2   : > { %v1049_v47 = vadd.f32 %v1041_v14, %v1040_v24  ;;  %v1043_v35 = vsel %vm1009_vm4, 1.0, %v2704_v32  ;;  %v1016_v37 = vsel %vm1007_vm2, %v2448_v45, 0.0  ;;  %vm1011_vm6 = vcmp.ge.f32.partialorder %v2460_v31, %v1005_v39 }
 0x3a3   : > { %v1017_v52 = vsel %vm1008_vm3, %v2456_v29, 0.0  ;;  %v1044_v49 = vsel %vm1010_vm5, 1.0, %v2704_v32  ;;  %v1024_v30 = vadd.f32 %v1016_v37, %v1015_v43  ;;  %vm1012_vm7 = vcmp.ge.f32.partialorder %v2468_v55, %v1005_v39 }
 0x3a4   : > { %v1050_v0 = vadd.f32 %v1049_v47, %v1042_v46  ;;  %v1018_v10 = vsel %vm1009_vm4, %v2458_v19, 0.0  ;;  %v1045_v45 = vsel %vm1011_vm6, 1.0, %v2704_v32  ;;  %vm1013_vm8 = vcmp.ge.f32.partialorder %v2470_v12, %v1005_v39 }
 0x3a5   : > { %v1025_v7 = vadd.f32 %v1024_v30, %v1017_v52  ;;  %v1019_v1 = vsel %vm1010_vm5, %v2439_v41, 0.0  ;;  %v1046_v25 = vsel %vm1012_vm7, 1.0, %v2704_v32  ;;  %vm1014_vm9 = vcmp.ge.f32.partialorder %v2472_v20, %v1005_v39 }
 0x3a6   : > { %v1051_v6 = vadd.f32 %v1050_v0, %v1043_v35  ;;  %v1020_v27 = vsel %vm1011_vm6, %v2460_v31, 0.0  ;;  %v1047_v48 = vsel %vm1013_vm8, 1.0, %v2704_v32  ;;  %v1021_v41 = vsel %vm1012_vm7, %v2468_v55, 0.0 }
 0x3a7   : > { %v1026_v26 = vadd.f32 %v1025_v7, %v1018_v10  ;;  %v1048_v57 = vsel %vm1014_vm9, 1.0, %v2704_v32  ;;  %v1022_v3 = vsel %vm1013_vm8, %v2470_v12, 0.0  ;;  %v1023_v15 = vsel %vm1014_vm9, %v2472_v20, 0.0 }
 0x3a8   : > { %v1052_v29 = vadd.f32 %v1051_v6, %v1044_v49  ;;  %v1069_v55 = vsel %vm1068_vm10, %v2384_v54, %v2376_v51  ;;  %vm1082_vm1 = vcmask 57344  }
 0x3a9   : > { %v1027_v59 = vadd.f32 %v1026_v26, %v1019_v1  ;;  %v1071_v33 = vsel %vm1070_vm11, %v1069_v55, %v2382_v44 }
 0x3aa   : > { %v1053_v19 = vadd.f32 %v1052_v29, %v1045_v45  ;;  %v1073_v5 = vsel %vm1072_vm12, %v1071_v33, %v2523_v22 }
 0x3ab   : > { %v1028_v36 = vadd.f32 %v1027_v59, %v1020_v27  ;;  %v1075_v2 = vsel %vm1074_vm13, %v1073_v5, %v2386_v63 }
 0x3ac   : > { %v1054_v56 = vadd.f32 %v1053_v19, %v1046_v25  ;;  %v1077_v17 = vsel %vm1076_vm14, %v1075_v2, %v2388_v21 }
 0x3ad   : > { %v1029_v13 = vadd.f32 %v1028_v36, %v1021_v41  ;;  %v1079_v63 = vsel %vm1078_vm15, %v1077_v17, %v2390_v40 }
 0x3ae   : > { %v1055_v62 = vadd.f32 %v1054_v56, %v1047_v48 }
 0x3af   : > { %v1030_v58 = vadd.f32 %v1029_v13, %v1022_v3 }
 0x3b0   : > { %v1056_v34 = vadd.f32 %v1055_v62, %v1048_v57 }
 0x3b1   : > { %v1031_v31 = vadd.f32 %v1030_v58, %v1023_v15 }
 0x3b2   : > { %1057 = vadd.xlane.f32.xlu0 %v1056_v34 }
 0x3b6   : > { %1032 = vadd.xlane.f32.xlu0 %v1031_v31 }
 0x43f   : > { %v1058_v53 = vpop.xlane.xlu0 %1057 }
 0x440   : > { %v1059_v60 = vrot.slane %v1058_v53, 4 }
 0x442   : > { %v1060_v23 = vadd.f32 %v1059_v60, %v1058_v53 }
 0x443   : > { %v1033_v11 = vpop.xlane.xlu0 %1032 }
 0x444   : > { %v1061_v12 = vrot.slane %v1060_v23, 2  ;;  %v1034_v61 = vrot.slane %v1033_v11, 4 }
 0x446   : > { %v1062_v16 = vadd.f32 %v1061_v12, %v1060_v23  ;;  %v1035_v20 = vadd.f32 %v1034_v61, %v1033_v11 }
 0x448   : > { %v1063_v8 = vrot.slane %v1062_v16, 1  ;;  %v1036_v42 = vrot.slane %v1035_v20, 2 }
 0x44a   : > { %v1064_v51 = vadd.f32 %v1063_v8, %v1062_v16  ;;  %v1037_v54 = vadd.f32 %v1036_v42, %v1035_v20 }
 0x44c   : > { %v1065_v44 = vsub.f32 %v2519_v4, %v1064_v51  ;;  %v1038_v38 = vrot.slane %v1037_v54, 1 }
 0x44e   : > { %v1066_v50 = vmul.f32 %v1065_v44, %v2702_v28  ;;  %v1039_v22 = vadd.f32 %v1038_v38, %v1037_v54 }
 0x450   : > { %v1067_v18 = vadd.f32 %v1066_v50, %v1039_v22 }
 0x452   : > { %v1081_v21 = vsel %vm1080_vm0, %v1079_v63, %v1067_v18 }
 0x453   : > { %1083 = vst.msk [vmem:[%s417_s30] sm:$0x1] %vm1082_vm1, %v1081_v21 }
 0x454   : > { %1636 = shalt.err (!%p1633_p7)
}
 0x455   : > { %s1637_s29 = scalar_lea.hbm %s2600_s12, 16  ;;  %s1641_s9 = scalar_lea.hbm %s2656_s5, 32 }
 0x456   : > { %p1638_p8 = scmp.ne.s32.totalorder %s2600_s12, %s1637_s29  ;;  %p1642_p4 = scmp.lt.u32.totalorder %s2600_s12, %s2656_s5 }
 0x457   : > { %p1643_p12 = scmp.lt.u32.totalorder %s1641_s9, %s1637_s29  ;;  %p1645_p0 = scmp.lt.u32.totalorder %s1637_s29, %s2600_s12 }
 0x458   : > { %p1639_p9 = pnand %p1638_p8, %p2705_p2 }
 0x459   : > { %p1644_p6 = por %p1643_p12, %p1642_p4 }
 0x45a   : > { %p1640_p1 = pneg %p1639_p9 }
 0x45b   : > { %p1646_p3 = por %p1645_p0, %p1644_p6 }
 0x45d   : > { %p1647_p13 = pnand %p1646_p3, %p1640_p1 }
 0x45f   : > { %1650 = shalt.err (!%p1647_p13)
}
 0x460   : > { %1350 = dma.vmem_to_hbm [thread:$0]  (%p2705_p2), %s2602_s1, 16, %s2600_s12, %s1085_s21  }
 0x461 PF: > { %s2706_s11 = sld [smem:[#allocation25_spill]]  ;;  %s1109_s14 = sand.u32 1, %s1717_s18  }
 0x462   : > { %p2707_p11 = scmp.ne.s32.totalorder %s2680_s8, 0  ;;  %s1110_s24 = scalar_lea.sflag [#allocation12], %s1109_s14 }
 0x467   : > { %p2708_p10 = scmp.ge.s32.totalorder %s2706_s11, 2 }
 0x469   : > { %p1369_p5 = pnand %p2708_p10, %p2707_p11 }
 0x46b   : > { %1712 = dma.done.wait (!%p1369_p5), %s1110_s24, 16  }
 0x46c   : > { %1714 = vsyncadd (!%p1369_p5), %s1110_s24, 4294967280  ;;  %s27_s23 = sadd.s32 1, %s2706_s11   ;;  %s2709_s6 = sld [smem:[#allocation27_spill]] }
 0x46d   : > { %p24_p7 = scmp.ge.s32.totalorder %s27_s23, 4   ;;  %s2710_s21 = sld [smem:[#allocation24_spill]] }
 0x46e   : > { %s2711_s22 = sld [smem:[#allocation26_spill]]  ;;  %s2712_s18 = smov %s1721_s19 }
 0x46f   : > { %s2713_s19 = smov %s1725_s20  ;;  %26 = sbr.rel (!%p24_p7) target bundleno = 13 (0xd), region = 179 }
 0x472   : > { %s2714_s20 = smov %s2709_s6 }
 0x476   :  { %1114 = vsyncpa [#allocation11], 1 }
 0x477   :  { %1116 = vsyncpa [#allocation11 + $0x1], 1 }
 0x478   :  { %1117 = vsyncpa [#allocation14], 1 }
 0x479   :  { %1119 = vsyncpa [#allocation14 + $0x1], 1 }
 0x47a   :  { %1120 = vsyncpa [#allocation17], 1 }
 0x47b   :  { %1122 = vsyncpa [#allocation17 + $0x1], 1 }
 0x47c   :  { %1123 = vsyncpa [#allocation12], 1 }
 0x47d   :  { %1125 = vsyncpa [#allocation12 + $0x1], 1 }

</bundles_post_ra>
